<compile_context>
chip_gen: v7x
topology: tpu7x:2x2x1
jax: 0.10.0
libtpu: 0.0.40
codegen_flags: <defaults>
</compile_context>

<pallas_src>
import math

import jax
import jax.numpy as jnp
from jax import lax
from jax.experimental import pallas as pl
from jax.experimental.pallas import tpu as pltpu

TEMP = 0.1
ALPHA = 0.5
EPS = 1e-8
NEG_INF = -1e30


def _first_argmax_onehot(x, ncols):
    """One-hot of the FIRST argmax along the last dim (matches torch.argmax tie-breaking)."""
    col = lax.broadcasted_iota(jnp.int32, x.shape, x.ndim - 1)
    m = jnp.max(x, axis=-1, keepdims=True)
    idx = jnp.min(jnp.where(x == m, col, ncols), axis=-1, keepdims=True)
    return (col == idx).astype(jnp.float32)


# ---------------------------------------------------------------------------
# Fused kernel: ICL loss (patch + object side) and room-retrieval scores for a
# block of Bb batch items.
# ---------------------------------------------------------------------------
def fused_icl_room_kernel(pos_ref, pps_ref, oos_ref, e1i_ref, e1j_ref, e2j_ref,
                          f1j_ref, mask_ref, stats_ref, score_ref):
    f32 = jnp.float32
    pos = pos_ref[...]                    # [Bb, P, O]  similarities (f32)
    pps = pps_ref[...]                    # [Bb, P, P]
    oos = oos_ref[...]                    # [Bb, O, O]
    e1i = e1i_ref[...].astype(f32)        # masks stored bf16 in HBM, compute in f32
    e1j = e1j_ref[...].astype(f32)
    e2j = e2j_ref[...].astype(f32)
    f1j = f1j_ref[...].astype(f32)
    mask = mask_ref[...].astype(f32)      # [Bb, S, O]

    Bb, P, O = pos.shape
    inv_t = 1.0 / TEMP

    pos_exp = jnp.exp(pos * inv_t)
    pps_exp = jnp.exp(pps * inv_t)
    oos_exp = jnp.exp(oos * inv_t)

    # ---------------- patch side ----------------
    delta = jnp.sum(e1i * pos_exp, axis=-1)                 # [Bb, P]  delta_E1i_E2i
    s_e1j = jnp.sum(e1j * pps_exp, axis=-1)                 # [Bb, P]
    prod_e2j = e2j * pos_exp                                # computed once, reduced twice
    s_e2j = jnp.sum(prod_e2j, axis=-1)                      # [Bb, P]
    loss_patch = delta / (delta + s_e1j + s_e2j + EPS)

    # ---------------- object side ----------------
    gt_onehot = _first_argmax_onehot(e1i, O)                # [Bb, P, O] one-hot of gt obj idx
    f1j_all = jnp.sum(f1j * oos_exp, axis=-1)               # [Bb, O]
    s_f1j = jnp.sum(gt_onehot * f1j_all[:, None, :], axis=-1)   # [Bb, P]  (VPU, no MXU)
    f2j_all = jnp.sum(prod_e2j, axis=1)                     # [Bb, O]  (f2j = e2j.T reduction)
    s_f2j = jnp.sum(gt_onehot * f2j_all[:, None, :], axis=-1)   # [Bb, P]
    loss_obj = delta / (delta + s_f1j + s_f2j + EPS)

    # ---------------- combine ----------------
    valid = jnp.sum(e1i, axis=-1) > 0.0                     # [Bb, P]
    loss = (-jnp.log(loss_patch + EPS)) * ALPHA + (-jnp.log(loss_obj + EPS)) * (1.0 - ALPHA)
    match_onehot = _first_argmax_onehot(pos, O)             # argmax over objects
    label = jnp.sum(e1i * match_onehot, axis=-1)            # [Bb, P] 0/1

    loss_w = jnp.where(valid, loss, 0.0)
    valid_f = valid.astype(f32)
    label_w = jnp.where(valid, label, 0.0)

    # Single lane-dense [Bb, 3, P] slab store (row 0: loss, 1: valid, 2: label).
    row = lax.broadcasted_iota(jnp.int32, (Bb, 3, P), 1)
    stats = jnp.where(row == 0, loss_w[:, None, :],
                      jnp.where(row == 1, valid_f[:, None, :], label_w[:, None, :]))
    stats_ref[...] = stats

    # ---------------- room retrieval (fused, reuses `pos` tile) ----------------
    # score[b, s] = sum_p max_{o in scan s} patch_obj_sim[b, p, o]
    masked = jnp.where(mask[:, :, None, :] > 0.0, pos[:, None, :, :], NEG_INF)  # [Bb,S,P,O]
    per_patch = jnp.max(masked, axis=-1)                    # [Bb, S, P]
    raw_score = jnp.sum(per_patch, axis=-1)                 # [Bb, S]
    has_obj = jnp.sum(mask, axis=-1) > 0.0                  # [Bb, S]
    score = jnp.where(has_obj, raw_score, NEG_INF)          # clamp empty scans (no -1e30*P overflow)
    score_ref[...] = score[:, None, :]                      # [Bb, 1, S] lane-dense


def _choose_batch_block(B, per_item_bytes, budget_bytes=16 * 1024 * 1024):
    """Largest divisor of B whose double-buffered footprint fits the VMEM budget."""
    bb = 1
    for cand in range(1, B + 1):
        if B % cand == 0 and 2 * cand * per_item_bytes <= budget_bytes:
            bb = cand
    return bb


def icl_room_fused(patch_obj_sim, patch_patch_sim, obj_obj_sim, e1i, e1j, e2j, f1j, scan_mask):
    B, P, O = patch_obj_sim.shape
    S = scan_mask.shape[1]

    # Narrow 0/1 association masks for HBM traffic; values are exact in bf16.
    ins = (patch_obj_sim.astype(jnp.float32),
           patch_patch_sim.astype(jnp.float32),
           obj_obj_sim.astype(jnp.float32),
           e1i.astype(jnp.bfloat16),
           e1j.astype(jnp.bfloat16),
           e2j.astype(jnp.bfloat16),
           f1j.astype(jnp.bfloat16),
           scan_mask.astype(jnp.bfloat16))

    # VMEM budget: inputs + outputs + rough allowance for f32 intermediates per item.
    per_item_bytes = sum(int(math.prod(x.shape[1:])) * x.dtype.itemsize for x in ins)
    per_item_bytes += (3 * P + S) * 4                       # outputs
    per_item_bytes += (8 * P * O + S * P * O) * 4           # in-kernel temporaries (estimate)
    Bb = _choose_batch_block(B, per_item_bytes)

    in_specs = [pl.BlockSpec((Bb,) + x.shape[1:], lambda b: (b, 0, 0)) for x in ins]
    out_specs = (pl.BlockSpec((Bb, 3, P), lambda b: (b, 0, 0)),
                 pl.BlockSpec((Bb, 1, S), lambda b: (b, 0, 0)))
    out_shape = (jax.ShapeDtypeStruct((B, 3, P), jnp.float32),
                 jax.ShapeDtypeStruct((B, 1, S), jnp.float32))

    stats, scores = pl.pallas_call(
        fused_icl_room_kernel,
        out_shape=out_shape,
        grid=(B // Bb,),
        in_specs=in_specs,
        out_specs=out_specs,
        compiler_params=pltpu.CompilerParams(
            dimension_semantics=("parallel",),          # batch axis -> both TCs on v7x
            vmem_limit_bytes=48 * 1024 * 1024),
    )(*ins)
    return stats, scores[:, 0, :]                       # [B, 3, P], [B, S]


# ---------------------------------------------------------------------------
# Forward: 'loss' / 'matched_success_ratio' match ICLLossBothSidesSumOutLog.forward
# (use_temporal=False, use_depth_aux=False); R@k comes from the fused retrieval scores.
# ---------------------------------------------------------------------------
def validation_room_retrieval_loss(embs, data_dict):
    stats, scores = icl_room_fused(
        embs['patch_obj_sim'], embs['patch_patch_sim'], embs['obj_obj_sim'],
        data_dict['e1i_matrix'], data_dict['e1j_matrix'],
        data_dict['e2j_matrix'], data_dict['f1j_matrix'],
        data_dict['scan_mask'])

    loss = stats[:, 0, :]     # [B, P] (0 where invalid)
    valid = stats[:, 1, :]    # [B, P]
    label = stats[:, 2, :]    # [B, P]

    n_valid = jnp.maximum(jnp.sum(valid), 1.0)
    loss_mean = jnp.sum(loss) / n_valid                       # mean over valid patches (all items)
    matched_success_ratio = jnp.sum(label) / n_valid

    target = data_dict['target_scan_idx']                     # [B]
    tscore = jnp.take_along_axis(scores, target[:, None], axis=1)[:, 0]   # [B]
    rank = jnp.sum((scores > tscore[:, None]).astype(jnp.int32), axis=-1)  # [B]
    pos = tscore > 0.0
    r_at = lambda k: jnp.mean(((rank < k) & pos).astype(jnp.float32))

    return {
        'loss': loss_mean,
        'matched_success_ratio': matched_success_ratio,
        'R@1': r_at(1),
        'R@3': r_at(3),
        'R@5': r_at(5),
    }


# ---------------------------------------------------------------------------
# Pure-JAX reference (mirrors the PyTorch math) for a light correctness check
# ---------------------------------------------------------------------------
def _reference(embs, data_dict):
    B = embs['patch_obj_sim'].shape[0]
    all_loss, all_label = [], []
    for b in range(B):
        pos = embs['patch_obj_sim'][b]
        pps = embs['patch_patch_sim'][b]
        oos = embs['obj_obj_sim'][b]
        e1i = data_dict['e1i_matrix'][b]
        e1j = data_dict['e1j_matrix'][b]
        e2j = data_dict['e2j_matrix'][b]
        f1j = data_dict['f1j_matrix'][b]
        pos_e, pps_e, oos_e = jnp.exp(pos / TEMP), jnp.exp(pps / TEMP), jnp.exp(oos / TEMP)
        dE = (e1i * pos_e).sum(-1)
        s1 = (e1j * pps_e).sum(-1)
        s2 = (e2j * pos_e).sum(-1)
        lp = dE / (dE + s1 + s2 + EPS)
        gt = jnp.argmax(e1i, axis=1)
        f1j_all = (f1j * oos_e).sum(-1)
        f2j_all = (e2j * pos_e).sum(0)
        lo = dE / (dE + f1j_all[gt] + f2j_all[gt] + EPS)
        valid = e1i.sum(-1) > 0
        loss = -jnp.log(lp + EPS) * ALPHA + -jnp.log(lo + EPS) * (1 - ALPHA)
        lab = e1i[jnp.arange(e1i.shape[0]), jnp.argmax(pos, axis=1)]
        all_loss.append(loss[valid])
        all_label.append(lab[valid])
    return jnp.concatenate(all_loss).mean(), jnp.concatenate(all_label).mean()


def _reference_scores(patch_obj_sim, scan_mask):
    masked = jnp.where(scan_mask[:, :, None, :] > 0.0, patch_obj_sim[:, None, :, :], NEG_INF)
    raw = masked.max(-1).sum(-1)
    has_obj = scan_mask.sum(-1) > 0.0
    return jnp.where(has_obj, raw, NEG_INF)


if __name__ == "__main__":
    B, P, O, S = 2, 16, 16, 4
    key = jax.random.PRNGKey(0)
    ks = jax.random.split(key, 8)

    patch_obj_sim = jax.random.normal(ks[0], (B, P, O), jnp.float32)
    patch_patch_sim = jax.random.normal(ks[1], (B, P, P), jnp.float32)
    obj_obj_sim = jax.random.normal(ks[2], (B, O, O), jnp.float32)

    gt_obj = jax.random.randint(ks[3], (B, P), 0, O)
    valid_rows = (jnp.arange(P) % 3 != 0).astype(jnp.float32)        # some patches invalid
    e1i = jax.nn.one_hot(gt_obj, O, dtype=jnp.float32) * valid_rows[None, :, None]
    e1j = (jax.random.uniform(ks[4], (B, P, P)) < 0.3).astype(jnp.float32)
    e2j = (jax.random.uniform(ks[5], (B, P, O)) < 0.3).astype(jnp.float32)
    f1j = (jax.random.uniform(ks[6], (B, O, O)) < 0.3).astype(jnp.float32)

    # candidate-scan membership: object o belongs to scan (o % S)
    scan_mask = (jnp.arange(O)[None, :] % S == jnp.arange(S)[:, None]).astype(jnp.float32)
    scan_mask = jnp.broadcast_to(scan_mask, (B, S, O))
    target_scan_idx = jnp.array([0, 1], dtype=jnp.int32)

    embs = {'patch_obj_sim': patch_obj_sim,
            'patch_patch_sim': patch_patch_sim,
            'obj_obj_sim': obj_obj_sim}
    data_dict = {'e1i_matrix': e1i, 'e1j_matrix': e1j, 'e2j_matrix': e2j,
                 'f1j_matrix': f1j, 'scan_mask': scan_mask,
                 'target_scan_idx': target_scan_idx}

    out = validation_room_retrieval_loss(embs, data_dict)
    jax.block_until_ready(out['loss'])

    ref_loss, ref_msr = _reference(embs, data_dict)
    assert jnp.allclose(out['loss'], ref_loss, rtol=1e-4, atol=1e-4), (out['loss'], ref_loss)
    assert jnp.allclose(out['matched_success_ratio'], ref_msr, rtol=1e-4, atol=1e-4)

    _, scores = icl_room_fused(patch_obj_sim, patch_patch_sim, obj_obj_sim,
                               e1i, e1j, e2j, f1j, scan_mask)
    assert jnp.allclose(scores, _reference_scores(patch_obj_sim, scan_mask), rtol=1e-4, atol=1e-4)

    print("KERNEL_OK")
</pallas_src>

<mosaic_0001>
module attributes {stable_mosaic.version = 11 : i64} {
  func.func @fused_icl_room_kernel(%arg0: i32, %arg1: memref<2x16x16xf32, #tpu.memory_space<vmem>>, %arg2: memref<2x16x16xf32, #tpu.memory_space<vmem>>, %arg3: memref<2x16x16xf32, #tpu.memory_space<vmem>>, %arg4: memref<2x16x16xbf16, #tpu.memory_space<vmem>>, %arg5: memref<2x16x16xbf16, #tpu.memory_space<vmem>>, %arg6: memref<2x16x16xbf16, #tpu.memory_space<vmem>>, %arg7: memref<2x16x16xbf16, #tpu.memory_space<vmem>>, %arg8: memref<2x4x16xbf16, #tpu.memory_space<vmem>>, %arg9: memref<2x3x16xf32, #tpu.memory_space<vmem>>, %arg10: memref<2x1x4xf32, #tpu.memory_space<vmem>>) attributes {dimension_semantics = [#tpu.dimension_semantics<parallel>], iteration_bounds = array<i64: 1>, scalar_prefetch = 0 : i64, scratch_operands = 0 : i64, tpu.core_type = #tpu.core_type<tc>, window_params = [{transform_indices = @transform_0, window_bounds = array<i64: 2, 16, 16>}, {transform_indices = @transform_1, window_bounds = array<i64: 2, 16, 16>}, {transform_indices = @transform_2, window_bounds = array<i64: 2, 16, 16>}, {transform_indices = @transform_3, window_bounds = array<i64: 2, 16, 16>}, {transform_indices = @transform_4, window_bounds = array<i64: 2, 16, 16>}, {transform_indices = @transform_5, window_bounds = array<i64: 2, 16, 16>}, {transform_indices = @transform_6, window_bounds = array<i64: 2, 16, 16>}, {transform_indices = @transform_7, window_bounds = array<i64: 2, 4, 16>}, {transform_indices = @transform_8, window_bounds = array<i64: 2, 3, 16>}, {transform_indices = @transform_9, window_bounds = array<i64: 2, 1, 4>}]} {
    %c0 = arith.constant 0 : index
    %c0_0 = arith.constant 0 : index
    %c0_1 = arith.constant 0 : index
    %0 = vector.load %arg1[%c0, %c0_0, %c0_1] : memref<2x16x16xf32, #tpu.memory_space<vmem>>, vector<2x16x16xf32>
    %c0_2 = arith.constant 0 : index
    %c0_3 = arith.constant 0 : index
    %c0_4 = arith.constant 0 : index
    %1 = vector.load %arg2[%c0_2, %c0_3, %c0_4] : memref<2x16x16xf32, #tpu.memory_space<vmem>>, vector<2x16x16xf32>
    %c0_5 = arith.constant 0 : index
    %c0_6 = arith.constant 0 : index
    %c0_7 = arith.constant 0 : index
    %2 = vector.load %arg3[%c0_5, %c0_6, %c0_7] : memref<2x16x16xf32, #tpu.memory_space<vmem>>, vector<2x16x16xf32>
    %c0_8 = arith.constant 0 : index
    %c0_9 = arith.constant 0 : index
    %c0_10 = arith.constant 0 : index
    %3 = vector.load %arg4[%c0_8, %c0_9, %c0_10] : memref<2x16x16xbf16, #tpu.memory_space<vmem>>, vector<2x16x16xbf16>
    %4 = arith.extf %3 : vector<2x16x16xbf16> to vector<2x16x16xf32>
    %c0_11 = arith.constant 0 : index
    %c0_12 = arith.constant 0 : index
    %c0_13 = arith.constant 0 : index
    %5 = vector.load %arg5[%c0_11, %c0_12, %c0_13] : memref<2x16x16xbf16, #tpu.memory_space<vmem>>, vector<2x16x16xbf16>
    %6 = arith.extf %5 : vector<2x16x16xbf16> to vector<2x16x16xf32>
    %c0_14 = arith.constant 0 : index
    %c0_15 = arith.constant 0 : index
    %c0_16 = arith.constant 0 : index
    %7 = vector.load %arg6[%c0_14, %c0_15, %c0_16] : memref<2x16x16xbf16, #tpu.memory_space<vmem>>, vector<2x16x16xbf16>
    %8 = arith.extf %7 : vector<2x16x16xbf16> to vector<2x16x16xf32>
    %c0_17 = arith.constant 0 : index
    %c0_18 = arith.constant 0 : index
    %c0_19 = arith.constant 0 : index
    %9 = vector.load %arg7[%c0_17, %c0_18, %c0_19] : memref<2x16x16xbf16, #tpu.memory_space<vmem>>, vector<2x16x16xbf16>
    %10 = arith.extf %9 : vector<2x16x16xbf16> to vector<2x16x16xf32>
    %c0_20 = arith.constant 0 : index
    %c0_21 = arith.constant 0 : index
    %c0_22 = arith.constant 0 : index
    %11 = vector.load %arg8[%c0_20, %c0_21, %c0_22] : memref<2x4x16xbf16, #tpu.memory_space<vmem>>, vector<2x4x16xbf16>
    %12 = arith.extf %11 : vector<2x4x16xbf16> to vector<2x4x16xf32>
    %cst = arith.constant 1.000000e+01 : f32
    %13 = vector.broadcast %cst : f32 to vector<2x16x16xf32>
    %14 = arith.mulf %0, %13 : vector<2x16x16xf32>
    %15 = math.exp %14 : vector<2x16x16xf32>
    %cst_23 = arith.constant 1.000000e+01 : f32
    %16 = vector.broadcast %cst_23 : f32 to vector<2x16x16xf32>
    %17 = arith.mulf %1, %16 : vector<2x16x16xf32>
    %18 = math.exp %17 : vector<2x16x16xf32>
    %cst_24 = arith.constant 1.000000e+01 : f32
    %19 = vector.broadcast %cst_24 : f32 to vector<2x16x16xf32>
    %20 = arith.mulf %2, %19 : vector<2x16x16xf32>
    %21 = math.exp %20 : vector<2x16x16xf32>
    %22 = arith.mulf %4, %15 : vector<2x16x16xf32>
    %cst_25 = arith.constant dense<0.000000e+00> : vector<2x16xf32>
    %23 = vector.multi_reduction <add>, %22, %cst_25 [2] : vector<2x16x16xf32> to vector<2x16xf32>
    %24 = arith.mulf %6, %18 : vector<2x16x16xf32>
    %cst_26 = arith.constant dense<0.000000e+00> : vector<2x16xf32>
    %25 = vector.multi_reduction <add>, %24, %cst_26 [2] : vector<2x16x16xf32> to vector<2x16xf32>
    %26 = arith.mulf %8, %15 : vector<2x16x16xf32>
    %cst_27 = arith.constant dense<0.000000e+00> : vector<2x16xf32>
    %27 = vector.multi_reduction <add>, %26, %cst_27 [2] : vector<2x16x16xf32> to vector<2x16xf32>
    %28 = arith.addf %23, %25 : vector<2x16xf32>
    %29 = arith.addf %28, %27 : vector<2x16xf32>
    %cst_28 = arith.constant 9.99999993E-9 : f32
    %30 = vector.broadcast %cst_28 : f32 to vector<2x16xf32>
    %31 = arith.addf %29, %30 : vector<2x16xf32>
    %32 = arith.divf %23, %31 : vector<2x16xf32>
    %33 = tpu.iota {dimensions = array<i32: 2>} : vector<2x16x16xi32>
    %cst_29 = arith.constant dense<0xFF800000> : vector<2x16xf32>
    %34 = vector.multi_reduction <maximumf>, %4, %cst_29 [2] : vector<2x16x16xf32> to vector<2x16xf32>
    %35 = vector.shape_cast %34 : vector<2x16xf32> to vector<2x16x1xf32>
    %36 = vector.broadcast %35 : vector<2x16x1xf32> to vector<2x16x16xf32>
    %37 = arith.cmpf oeq, %4, %36 : vector<2x16x16xf32>
    %c16_i32 = arith.constant 16 : i32
    %38 = vector.broadcast %c16_i32 : i32 to vector<2x16x16xi32>
    %39 = arith.select %37, %33, %38 : vector<2x16x16xi1>, vector<2x16x16xi32>
    %cst_30 = arith.constant dense<2147483647> : vector<2x16xi32>
    %40 = vector.multi_reduction <minsi>, %39, %cst_30 [2] : vector<2x16x16xi32> to vector<2x16xi32>
    %41 = vector.shape_cast %40 : vector<2x16xi32> to vector<2x16x1xi32>
    %42 = vector.broadcast %41 : vector<2x16x1xi32> to vector<2x16x16xi32>
    %43 = arith.cmpi eq, %33, %42 : vector<2x16x16xi32>
    %44 = arith.extui %43 : vector<2x16x16xi1> to vector<2x16x16xi32>
    %45 = arith.sitofp %44 : vector<2x16x16xi32> to vector<2x16x16xf32>
    %46 = arith.mulf %10, %21 : vector<2x16x16xf32>
    %cst_31 = arith.constant dense<0.000000e+00> : vector<2x16xf32>
    %47 = vector.multi_reduction <add>, %46, %cst_31 [2] : vector<2x16x16xf32> to vector<2x16xf32>
    %48 = vector.shape_cast %47 : vector<2x16xf32> to vector<2x1x16xf32>
    %49 = vector.broadcast %48 : vector<2x1x16xf32> to vector<2x16x16xf32>
    %50 = arith.mulf %45, %49 : vector<2x16x16xf32>
    %cst_32 = arith.constant dense<0.000000e+00> : vector<2x16xf32>
    %51 = vector.multi_reduction <add>, %50, %cst_32 [2] : vector<2x16x16xf32> to vector<2x16xf32>
    %cst_33 = arith.constant dense<0.000000e+00> : vector<2x16xf32>
    %52 = vector.multi_reduction <add>, %26, %cst_33 [1] : vector<2x16x16xf32> to vector<2x16xf32>
    %53 = vector.shape_cast %52 : vector<2x16xf32> to vector<2x1x16xf32>
    %54 = vector.broadcast %53 : vector<2x1x16xf32> to vector<2x16x16xf32>
    %55 = arith.mulf %45, %54 : vector<2x16x16xf32>
    %cst_34 = arith.constant dense<0.000000e+00> : vector<2x16xf32>
    %56 = vector.multi_reduction <add>, %55, %cst_34 [2] : vector<2x16x16xf32> to vector<2x16xf32>
    %57 = arith.addf %23, %51 : vector<2x16xf32>
    %58 = arith.addf %57, %56 : vector<2x16xf32>
    %cst_35 = arith.constant 9.99999993E-9 : f32
    %59 = vector.broadcast %cst_35 : f32 to vector<2x16xf32>
    %60 = arith.addf %58, %59 : vector<2x16xf32>
    %61 = arith.divf %23, %60 : vector<2x16xf32>
    %cst_36 = arith.constant dense<0.000000e+00> : vector<2x16xf32>
    %62 = vector.multi_reduction <add>, %4, %cst_36 [2] : vector<2x16x16xf32> to vector<2x16xf32>
    %cst_37 = arith.constant 0.000000e+00 : f32
    %63 = vector.broadcast %cst_37 : f32 to vector<2x16xf32>
    %64 = arith.cmpf ogt, %62, %63 : vector<2x16xf32>
    %cst_38 = arith.constant 9.99999993E-9 : f32
    %65 = vector.broadcast %cst_38 : f32 to vector<2x16xf32>
    %66 = arith.addf %32, %65 : vector<2x16xf32>
    %67 = math.log %66 : vector<2x16xf32>
    %cst_39 = arith.constant 0.000000e+00 : f32
    %68 = vector.broadcast %cst_39 : f32 to vector<2x16xf32>
    %69 = arith.subf %68, %67 : vector<2x16xf32>
    %cst_40 = arith.constant 5.000000e-01 : f32
    %70 = vector.broadcast %cst_40 : f32 to vector<2x16xf32>
    %71 = arith.mulf %69, %70 : vector<2x16xf32>
    %cst_41 = arith.constant 9.99999993E-9 : f32
    %72 = vector.broadcast %cst_41 : f32 to vector<2x16xf32>
    %73 = arith.addf %61, %72 : vector<2x16xf32>
    %74 = math.log %73 : vector<2x16xf32>
    %cst_42 = arith.constant 0.000000e+00 : f32
    %75 = vector.broadcast %cst_42 : f32 to vector<2x16xf32>
    %76 = arith.subf %75, %74 : vector<2x16xf32>
    %cst_43 = arith.constant 5.000000e-01 : f32
    %77 = vector.broadcast %cst_43 : f32 to vector<2x16xf32>
    %78 = arith.mulf %76, %77 : vector<2x16xf32>
    %79 = arith.addf %71, %78 : vector<2x16xf32>
    %80 = tpu.iota {dimensions = array<i32: 2>} : vector<2x16x16xi32>
    %cst_44 = arith.constant dense<0xFF800000> : vector<2x16xf32>
    %81 = vector.multi_reduction <maximumf>, %0, %cst_44 [2] : vector<2x16x16xf32> to vector<2x16xf32>
    %82 = vector.shape_cast %81 : vector<2x16xf32> to vector<2x16x1xf32>
    %83 = vector.broadcast %82 : vector<2x16x1xf32> to vector<2x16x16xf32>
    %84 = arith.cmpf oeq, %0, %83 : vector<2x16x16xf32>
    %c16_i32_45 = arith.constant 16 : i32
    %85 = vector.broadcast %c16_i32_45 : i32 to vector<2x16x16xi32>
    %86 = arith.select %84, %80, %85 : vector<2x16x16xi1>, vector<2x16x16xi32>
    %cst_46 = arith.constant dense<2147483647> : vector<2x16xi32>
    %87 = vector.multi_reduction <minsi>, %86, %cst_46 [2] : vector<2x16x16xi32> to vector<2x16xi32>
    %88 = vector.shape_cast %87 : vector<2x16xi32> to vector<2x16x1xi32>
    %89 = vector.broadcast %88 : vector<2x16x1xi32> to vector<2x16x16xi32>
    %90 = arith.cmpi eq, %80, %89 : vector<2x16x16xi32>
    %91 = arith.extui %90 : vector<2x16x16xi1> to vector<2x16x16xi32>
    %92 = arith.sitofp %91 : vector<2x16x16xi32> to vector<2x16x16xf32>
    %93 = arith.mulf %4, %92 : vector<2x16x16xf32>
    %cst_47 = arith.constant dense<0.000000e+00> : vector<2x16xf32>
    %94 = vector.multi_reduction <add>, %93, %cst_47 [2] : vector<2x16x16xf32> to vector<2x16xf32>
    %cst_48 = arith.constant 0.000000e+00 : f32
    %95 = vector.broadcast %cst_48 : f32 to vector<2x16xf32>
    %96 = arith.select %64, %79, %95 : vector<2x16xi1>, vector<2x16xf32>
    %97 = arith.extui %64 : vector<2x16xi1> to vector<2x16xi32>
    %98 = arith.sitofp %97 : vector<2x16xi32> to vector<2x16xf32>
    %cst_49 = arith.constant 0.000000e+00 : f32
    %99 = vector.broadcast %cst_49 : f32 to vector<2x16xf32>
    %100 = arith.select %64, %94, %99 : vector<2x16xi1>, vector<2x16xf32>
    %101 = tpu.iota {dimensions = array<i32: 1>} : vector<2x3x16xi32>
    %c0_i32 = arith.constant 0 : i32
    %102 = vector.broadcast %c0_i32 : i32 to vector<2x3x16xi32>
    %103 = arith.cmpi eq, %101, %102 : vector<2x3x16xi32>
    %104 = vector.shape_cast %96 : vector<2x16xf32> to vector<2x1x16xf32>
    %c1_i32 = arith.constant 1 : i32
    %105 = vector.broadcast %c1_i32 : i32 to vector<2x3x16xi32>
    %106 = arith.cmpi eq, %101, %105 : vector<2x3x16xi32>
    %107 = vector.shape_cast %98 : vector<2x16xf32> to vector<2x1x16xf32>
    %108 = vector.shape_cast %100 : vector<2x16xf32> to vector<2x1x16xf32>
    %109 = vector.shape_cast %107 : vector<2x1x16xf32> to vector<2x1x16xf32>
    %110 = vector.broadcast %109 : vector<2x1x16xf32> to vector<2x3x16xf32>
    %111 = vector.shape_cast %108 : vector<2x1x16xf32> to vector<2x1x16xf32>
    %112 = vector.broadcast %111 : vector<2x1x16xf32> to vector<2x3x16xf32>
    %113 = arith.select %106, %110, %112 : vector<2x3x16xi1>, vector<2x3x16xf32>
    %114 = vector.shape_cast %104 : vector<2x1x16xf32> to vector<2x1x16xf32>
    %115 = vector.broadcast %114 : vector<2x1x16xf32> to vector<2x3x16xf32>
    %116 = arith.select %103, %115, %113 : vector<2x3x16xi1>, vector<2x3x16xf32>
    %c0_50 = arith.constant 0 : index
    %c0_51 = arith.constant 0 : index
    %c0_52 = arith.constant 0 : index
    %117 = vector.load %arg9[%c0_50, %c0_51, %c0_52] : memref<2x3x16xf32, #tpu.memory_space<vmem>>, vector<2x3x16xf32>
    tpu.vector_store %arg9[%c0_50, %c0_51, %c0_52], %116 {strides = array<i32>} : memref<2x3x16xf32, #tpu.memory_space<vmem>>, vector<2x3x16xf32>,
    %118 = vector.shape_cast %12 : vector<2x4x16xf32> to vector<2x4x1x16xf32>
    %cst_53 = arith.constant 0.000000e+00 : f32
    %119 = vector.broadcast %cst_53 : f32 to vector<2x4x1x16xf32>
    %120 = arith.cmpf ogt, %118, %119 : vector<2x4x1x16xf32>
    %121 = vector.shape_cast %0 : vector<2x16x16xf32> to vector<2x1x16x16xf32>
    %cst_54 = arith.constant -1.000000e+30 : f32
    %122 = vector.shape_cast %120 : vector<2x4x1x16xi1> to vector<2x4x1x16xi1>
    %123 = vector.broadcast %122 : vector<2x4x1x16xi1> to vector<2x4x16x16xi1>
    %124 = vector.shape_cast %121 : vector<2x1x16x16xf32> to vector<2x1x16x16xf32>
    %125 = vector.broadcast %124 : vector<2x1x16x16xf32> to vector<2x4x16x16xf32>
    %126 = vector.broadcast %cst_54 : f32 to vector<2x4x16x16xf32>
    %127 = arith.select %123, %125, %126 : vector<2x4x16x16xi1>, vector<2x4x16x16xf32>
    %cst_55 = arith.constant dense<0xFF800000> : vector<2x4x16xf32>
    %128 = vector.multi_reduction <maximumf>, %127, %cst_55 [3] : vector<2x4x16x16xf32> to vector<2x4x16xf32>
    %cst_56 = arith.constant dense<0.000000e+00> : vector<2x4xf32>
    %129 = vector.multi_reduction <add>, %128, %cst_56 [2] : vector<2x4x16xf32> to vector<2x4xf32>
    %cst_57 = arith.constant dense<0.000000e+00> : vector<2x4xf32>
    %130 = vector.multi_reduction <add>, %12, %cst_57 [2] : vector<2x4x16xf32> to vector<2x4xf32>
    %cst_58 = arith.constant 0.000000e+00 : f32
    %131 = vector.broadcast %cst_58 : f32 to vector<2x4xf32>
    %132 = arith.cmpf ogt, %130, %131 : vector<2x4xf32>
    %cst_59 = arith.constant -1.000000e+30 : f32
    %133 = vector.broadcast %cst_59 : f32 to vector<2x4xf32>
    %134 = arith.select %132, %129, %133 : vector<2x4xi1>, vector<2x4xf32>
    %135 = vector.shape_cast %134 : vector<2x4xf32> to vector<2x1x4xf32>
    %c0_60 = arith.constant 0 : index
    %c0_61 = arith.constant 0 : index
    %c0_62 = arith.constant 0 : index
    %136 = vector.load %arg10[%c0_60, %c0_61, %c0_62] : memref<2x1x4xf32, #tpu.memory_space<vmem>>, vector<2x1x4xf32>
    tpu.vector_store %arg10[%c0_60, %c0_61, %c0_62], %135 {strides = array<i32>} : memref<2x1x4xf32, #tpu.memory_space<vmem>>, vector<2x1x4xf32>,
    return
  }
  func.func @transform_0(%arg0: i32) -> (i32, i32, i32) {
    %c0_i32 = arith.constant 0 : i32
    %c0_i32_0 = arith.constant 0 : i32
    %c0_i32_1 = arith.constant 0 : i32
    return %arg0, %c0_i32, %c0_i32_0 : i32, i32, i32
  }
  func.func @transform_1(%arg0: i32) -> (i32, i32, i32) {
    %c0_i32 = arith.constant 0 : i32
    %c0_i32_0 = arith.constant 0 : i32
    %c0_i32_1 = arith.constant 0 : i32
    return %arg0, %c0_i32, %c0_i32_0 : i32, i32, i32
  }
  func.func @transform_2(%arg0: i32) -> (i32, i32, i32) {
    %c0_i32 = arith.constant 0 : i32
    %c0_i32_0 = arith.constant 0 : i32
    %c0_i32_1 = arith.constant 0 : i32
    return %arg0, %c0_i32, %c0_i32_0 : i32, i32, i32
  }
  func.func @transform_3(%arg0: i32) -> (i32, i32, i32) {
    %c0_i32 = arith.constant 0 : i32
    %c0_i32_0 = arith.constant 0 : i32
    %c0_i32_1 = arith.constant 0 : i32
    return %arg0, %c0_i32, %c0_i32_0 : i32, i32, i32
  }
  func.func @transform_4(%arg0: i32) -> (i32, i32, i32) {
    %c0_i32 = arith.constant 0 : i32
    %c0_i32_0 = arith.constant 0 : i32
    %c0_i32_1 = arith.constant 0 : i32
    return %arg0, %c0_i32, %c0_i32_0 : i32, i32, i32
  }
  func.func @transform_5(%arg0: i32) -> (i32, i32, i32) {
    %c0_i32 = arith.constant 0 : i32
    %c0_i32_0 = arith.constant 0 : i32
    %c0_i32_1 = arith.constant 0 : i32
    return %arg0, %c0_i32, %c0_i32_0 : i32, i32, i32
  }
  func.func @transform_6(%arg0: i32) -> (i32, i32, i32) {
    %c0_i32 = arith.constant 0 : i32
    %c0_i32_0 = arith.constant 0 : i32
    %c0_i32_1 = arith.constant 0 : i32
    return %arg0, %c0_i32, %c0_i32_0 : i32, i32, i32
  }
  func.func @transform_7(%arg0: i32) -> (i32, i32, i32) {
    %c0_i32 = arith.constant 0 : i32
    %c0_i32_0 = arith.constant 0 : i32
    %c0_i32_1 = arith.constant 0 : i32
    return %arg0, %c0_i32, %c0_i32_0 : i32, i32, i32
  }
  func.func @transform_8(%arg0: i32) -> (i32, i32, i32) {
    %c0_i32 = arith.constant 0 : i32
    %c0_i32_0 = arith.constant 0 : i32
    %c0_i32_1 = arith.constant 0 : i32
    return %arg0, %c0_i32, %c0_i32_0 : i32, i32, i32
  }
  func.func @transform_9(%arg0: i32) -> (i32, i32, i32) {
    %c0_i32 = arith.constant 0 : i32
    %c0_i32_0 = arith.constant 0 : i32
    %c0_i32_1 = arith.constant 0 : i32
    return %arg0, %c0_i32, %c0_i32_0 : i32, i32, i32
  }
}

</mosaic_0001>

<bundles_post_ra>
// kernel: tpu_custom_call.1
= control target key start
LH: loop header
LB: loop body
LE: loop exit
PB: predicated region body
PF: predicated region fallthrough
CT: control target
= control target key end

     0   :  { %15 = vsyncpa [#allocation3], 0  ;;  %s2110_s0 = inlined_call_operand.hbm [shape: f32[2,16,16], index: 0, kind: input, shape index: {}]   ;;  %s2111_s1 = inlined_call_operand.hbm [shape: f32[2,16,16], index: 1, kind: input, shape index: {}]   ;;  %s2112_s2 = inlined_call_operand.hbm [shape: f32[2,16,16], index: 2, kind: input, shape index: {}]   ;;  %s2113_s3 = inlined_call_operand.hbm [shape: bf16[2,16,16], index: 3, kind: input, shape index: {}]   ;;  %s2114_s4 = inlined_call_operand.hbm [shape: bf16[2,16,16], index: 4, kind: input, shape index: {}]   ;;  %s2115_s5 = inlined_call_operand.vmem [shape: bf16[2,16,16], index: 5, kind: input, shape index: {}]   ;;  %s2116_s6 = inlined_call_operand.hbm [shape: bf16[2,16,16], index: 6, kind: input, shape index: {}]   ;;  %s2117_s7 = inlined_call_operand.vmem [shape: bf16[2,4,16], index: 7, kind: input, shape index: {}]   ;;  %s2118_s8 = inlined_call_operand.vmem [shape: f32[2,3,16], index: 8, kind: output, shape index: {0}]   ;;  %s2119_s9 = inlined_call_operand.hbm [shape: f32[2,1,4], index: 9, kind: output, shape index: {1}]  }
   0x1   :  { %16 = vsyncpa [#allocation6], 0 }
   0x2   :  { %17 = vsyncpa [#allocation9], 0 }
   0x3   :  { %18 = vsyncpa [#allocation12], 0 }
   0x4   :  { %19 = vsyncpa [#allocation4], 0  ;;  %s1375_s30 = smov [#allocation5]   ;;  %s1376_s11 = smov [#allocation8]  }
   0x5   :  { %s37_s10 = sshll.u32 %s1375_s30, 4  ;;  %s61_s12 = sshll.u32 %s1376_s11, 4  ;;  %s38_s10 = int_to_ptr.vmem [resolvable:$true] %s37_s10  ;;  %s1441_s12 = int_to_ptr.vmem [resolvable:$true] %s61_s12 }
   0x6   :  { %s1211_s15 = scalar_lea.hbm %s2111_s1, 512 }
   0x7   :  { %p1212_p0 = scmp.ne.s32.totalorder %s2111_s1, %s1211_s15  ;;  %p1215_p1 = scmp.lt.u32.totalorder %s1211_s15, %s2111_s1 }
   0x9   :  { %p1217_p2 = pnand %p1215_p1, %p1212_p0 }
   0xb   :  { %1220 = shalt.err (!%p1217_p2)
}
   0xc   :  { %s1221_s20 = scalar_lea.vmem %s38_s10, 512  ;;  %p1226_p4 = scmp.lt.s32.totalorder %s38_s10, %s38_s10 }
   0xd   :  { %p1222_p3 = scmp.ne.s32.totalorder %s38_s10, %s1221_s20  ;;  %p1227_p5 = scmp.lt.s32.totalorder %s1221_s20, %s1221_s20 }
   0xf   :  { %p1228_p6 = por %p1227_p5, %p1226_p4 }
  0x11   :  { %p1229_p7 = pnand %p1228_p6, %p1222_p3 }
  0x13   :  { %1232 = shalt.err (!%p1229_p7)
}
  0x14   :  { %s1377_s21 = smov 128   ;;  %s1378_s22 = smov 8  }
  0x15   :  { %43 = dma.hbm_to_vmem [thread:$0]  %s2111_s1, 512, %s38_s10, [#allocation6], %s1377_s21, %s1377_s21, %s1378_s22  }
  0x16   :  { %s1233_s27 = scalar_lea.hbm %s2113_s3, 256 }
  0x17   :  { %p1234_p8 = scmp.ne.s32.totalorder %s2113_s3, %s1233_s27  ;;  %p1237_p9 = scmp.lt.u32.totalorder %s1233_s27, %s2113_s3 }
  0x19   :  { %p1239_p10 = pnand %p1237_p9, %p1234_p8 }
  0x1b   :  { %1242 = shalt.err (!%p1239_p10)
}
  0x1c   :  { %s1243_s13 = scalar_lea.vmem %s1441_s12, 256  ;;  %p1248_p12 = scmp.lt.s32.totalorder %s1441_s12, %s1441_s12 }
  0x1d   :  { %p1244_p11 = scmp.ne.s32.totalorder %s1441_s12, %s1243_s13  ;;  %p1249_p13 = scmp.lt.s32.totalorder %s1243_s13, %s1243_s13 }
  0x1f   :  { %p1250_p0 = por %p1249_p13, %p1248_p12 }
  0x21   :  { %p1251_p1 = pnand %p1250_p0, %p1244_p11 }
  0x23   :  { %1254 = shalt.err (!%p1251_p1)
}
  0x24   :  { %s1379_s1 = smov 64   ;;  %s1380_s10 = smov 4  }
  0x25   :  { %67 = dma.hbm_to_vmem [thread:$0]  %s2113_s3, 256, %s1441_s12, [#allocation9], %s1379_s1, %s1379_s1, %s1380_s10  }
  0x26   :  { %s1381_s16 = smov [#allocation2]   ;;  %s1382_s18 = smov [#allocation7]  }
  0x27   :  { %s25_s17 = sshll.u32 %s1381_s16, 4  ;;  %s49_s19 = sshll.u32 %s1382_s18, 4  ;;  %s26_s17 = int_to_ptr.vmem [resolvable:$true] %s25_s17  ;;  %s1478_s19 = int_to_ptr.vmem [resolvable:$true] %s49_s19 }
  0x28   :  { %s1255_s24 = scalar_lea.hbm %s2110_s0, 512 }
  0x29   :  { %p1256_p2 = scmp.ne.s32.totalorder %s2110_s0, %s1255_s24  ;;  %p1259_p3 = scmp.lt.u32.totalorder %s1255_s24, %s2110_s0 }
  0x2b   :  { %p1261_p4 = pnand %p1259_p3, %p1256_p2 }
  0x2d   :  { %1264 = shalt.err (!%p1261_p4)
}
  0x2e   :  { %s1265_s3 = scalar_lea.vmem %s26_s17, 512  ;;  %p1270_p6 = scmp.lt.s32.totalorder %s26_s17, %s26_s17 }
  0x2f   :  { %p1266_p5 = scmp.ne.s32.totalorder %s26_s17, %s1265_s3  ;;  %p1271_p7 = scmp.lt.s32.totalorder %s1265_s3, %s1265_s3 }
  0x31   :  { %p1272_p8 = por %p1271_p7, %p1270_p6 }
  0x33   :  { %p1273_p9 = pnand %p1272_p8, %p1266_p5 }
  0x35   :  { %1276 = shalt.err (!%p1273_p9)
}
  0x36   :  { %31 = dma.hbm_to_vmem [thread:$0]  %s2110_s0, 512, %s26_s17, [#allocation3], %s1377_s21, %s1377_s21, %s1378_s22  }
  0x37   :  { %s1277_s13 = scalar_lea.hbm %s2112_s2, 512 }
  0x38   :  { %p1278_p10 = scmp.ne.s32.totalorder %s2112_s2, %s1277_s13  ;;  %p1281_p11 = scmp.lt.u32.totalorder %s1277_s13, %s2112_s2 }
  0x3a   :  { %p1283_p12 = pnand %p1281_p11, %p1278_p10 }
  0x3c   :  { %1286 = shalt.err (!%p1283_p12)
}
  0x3d   :  { %s1287_s20 = scalar_lea.vmem %s1478_s19, 512  ;;  %p1292_p0 = scmp.lt.s32.totalorder %s1478_s19, %s1478_s19 }
  0x3e   :  { %p1288_p13 = scmp.ne.s32.totalorder %s1478_s19, %s1287_s20  ;;  %p1293_p1 = scmp.lt.s32.totalorder %s1287_s20, %s1287_s20 }
  0x40   :  { %p1294_p2 = por %p1293_p1, %p1292_p0 }
  0x42   :  { %p1295_p3 = pnand %p1294_p2, %p1288_p13 }
  0x44   :  { %1298 = shalt.err (!%p1295_p3)
}
  0x45   :  { %55 = dma.hbm_to_vmem [thread:$0]  %s2112_s2, 512, %s1478_s19, [#allocation6], %s1377_s21, %s1377_s21, %s1378_s22  }
  0x46   :  { %s1383_s23 = smov [#allocation10]   ;;  %s1384_s25 = smov [#allocation11]  }
  0x47   :  { %s73_s24 = sshll.u32 %s1383_s23, 4  ;;  %s87_s26 = sshll.u32 %s1384_s25, 4  ;;  %s74_s24 = int_to_ptr.vmem [resolvable:$true] %s73_s24  ;;  %s1515_s26 = int_to_ptr.vmem [resolvable:$true] %s87_s26 }
  0x48   :  { %s1299_s3 = scalar_lea.hbm %s2114_s4, 256 }
  0x49   :  { %p1300_p4 = scmp.ne.s32.totalorder %s2114_s4, %s1299_s3  ;;  %p1303_p5 = scmp.lt.u32.totalorder %s1299_s3, %s2114_s4 }
  0x4b   :  { %p1305_p6 = pnand %p1303_p5, %p1300_p4 }
  0x4d   :  { %1308 = shalt.err (!%p1305_p6)
}
  0x4e   :  { %s1309_s2 = scalar_lea.vmem %s74_s24, 256  ;;  %p1314_p8 = scmp.lt.s32.totalorder %s74_s24, %s74_s24 }
  0x4f   :  { %p1310_p7 = scmp.ne.s32.totalorder %s74_s24, %s1309_s2  ;;  %p1315_p9 = scmp.lt.s32.totalorder %s1309_s2, %s1309_s2 }
  0x51   :  { %p1316_p10 = por %p1315_p9, %p1314_p8 }
  0x53   :  { %p1317_p11 = pnand %p1316_p10, %p1310_p7 }
  0x55   :  { %1320 = shalt.err (!%p1317_p11)
}
  0x56   :  { %79 = dma.hbm_to_vmem [thread:$0]  %s2114_s4, 256, %s74_s24, [#allocation9], %s1379_s1, %s1379_s1, %s1380_s10  }
  0x57   :  { %s1321_s14 = scalar_lea.hbm %s2116_s6, 256 }
  0x58   :  { %p1322_p12 = scmp.ne.s32.totalorder %s2116_s6, %s1321_s14  ;;  %p1325_p13 = scmp.lt.u32.totalorder %s1321_s14, %s2116_s6 }
  0x5a   :  { %p1327_p0 = pnand %p1325_p13, %p1322_p12 }
  0x5c   :  { %1330 = shalt.err (!%p1327_p0)
}
  0x5d   :  { %s1331_s0 = scalar_lea.vmem %s1515_s26, 256  ;;  %p1336_p2 = scmp.lt.s32.totalorder %s1515_s26, %s1515_s26 }
  0x5e   :  { %p1332_p1 = scmp.ne.s32.totalorder %s1515_s26, %s1331_s0  ;;  %p1337_p3 = scmp.lt.s32.totalorder %s1331_s0, %s1331_s0 }
  0x60   :  { %p1338_p4 = por %p1337_p3, %p1336_p2 }
  0x62   :  { %p1339_p5 = pnand %p1338_p4, %p1332_p1 }
  0x64   :  { %1342 = shalt.err (!%p1339_p5)
}
  0x65   :  { %93 = dma.hbm_to_vmem [thread:$0]  %s2116_s6, 256, %s1515_s26, [#allocation12], %s1379_s1, %s1379_s1, %s1380_s10  }
  0x66   :  { %1365 = dma.done.wait [#allocation3], 512  }
  0x67   :  { %1366 = vsyncadd [#allocation3], 4294966784 }
  0x68   :  { %1367 = dma.done.wait [#allocation6], 1024  }
  0x69   :  { %1368 = vsyncadd [#allocation6], 4294966272 }
  0x6a   :  { %1369 = dma.done.wait [#allocation9], 512  }
  0x6b   :  { %1370 = vsyncadd [#allocation9], 4294966784 }
  0x6c   :  { %1371 = dma.done.wait [#allocation12], 256  }
  0x6d   :  { %1372 = vsyncadd [#allocation12], 4294967040  ;;  %v1104_v0 = vld [vmem:[#allocation8] sm:$0xff]   ;;  %vm202_vm0 = vcmask 130048   ;;  %v1135_v1 = vld [vmem:[#allocation8 + $0x8] sm:$0xff]   ;;  %v267_v19 = vlaneseq }
  0x6e   :  { %v1552_v2 = vunpack.c.l.bf16 %v1104_v0  ;;  %v1554_v3 = vunpack.c.l.bf16 %v1135_v1  ;;  %v1556_v4 = vunpack.c.h.bf16 %v1104_v0  ;;  %v1558_v5 = vunpack.c.h.bf16 %v1135_v1  ;;  %v1568_v10 = vld [vmem:[#allocation2] sm:$0xff]  ;;  %v1570_v11 = vld [vmem:[#allocation2 + $0x8] sm:$0xff]  ;;  %v1576_v14 = vld [vmem:[#allocation2 + $0x10] sm:$0xff] }
  0x6f   :  { %v548_v12 = vsel %vm202_vm0, %v1568_v10, -inf  ;;  %v551_v13 = vsel %vm202_vm0, %v1570_v11, -inf  ;;  %v1578_v15 = vld [vmem:[#allocation2 + $0x18] sm:$0xff]  ;;  %v554_v16 = vsel %vm202_vm0, %v1576_v14, -inf  ;;  %v122_v18 = vld [vmem:[#allocation7] sm:$0xff]  ;;  %v1585_v21 = vand.u32 127, %v267_v19 }
  0x70   :  { %v269_v6 = vsel %vm202_vm0, %v1552_v2, -inf  ;;  %v275_v7 = vsel %vm202_vm0, %v1554_v3, -inf  ;;  %v272_v8 = vsel %vm202_vm0, %v1556_v4, -inf  ;;  %v278_v9 = vsel %vm202_vm0, %v1558_v5, -inf  ;;  %v123_v33 = vld [vmem:[#allocation7 + $0x8] sm:$0xff]  ;;  %v1128_v49 = vld [vmem:[#allocation11] sm:$0xff]  }
  0x71   :  { %270 = vmax.xlane.f32.xlu0 %v269_v6  ;;  %276 = vmax.xlane.f32.xlu1 %v275_v7  ;;  %v557_v17 = vsel %vm202_vm0, %v1578_v15, -inf  ;;  %v186_v20 = vmul.f32 10.0, %v122_v18  ;;  %v187_v39 = vmul.f32 10.0, %v123_v33  ;;  %v1129_v57 = vunpack.c.l.bf16 %v1128_v49 }
  0x73   :  { %v190_v24 = vmul.f32 1.442695, %v186_v20  ;;  %v192_v45 = vmul.f32 1.442695, %v187_v39  ;;  %v124_v20 = vld [vmem:[#allocation7 + $0x10] sm:$0xff] }
  0x75   :  { %273 = vmax.xlane.f32.xlu0 %v272_v8  ;;  %279 = vmax.xlane.f32.xlu1 %v278_v9  ;;  %1155 = vpow2.f32 %v190_v24  ;;  %v1130_v9 = vunpack.c.h.bf16 %v1128_v49  ;;  %v1385_v24 = vmov 1966171168  }
  0x76   :  { %1157 = vpow2.f32 %v192_v45 }
  0x79   :  { %549 = vmax.xlane.f32.xlu0 %v548_v12  ;;  %552 = vmax.xlane.f32.xlu1 %v551_v13 }
  0x7d   :  { %555 = vmax.xlane.f32.xlu0 %v554_v16  ;;  %558 = vmax.xlane.f32.xlu1 %v557_v17 }
  0x7f   :  { %v1156_v58 = vpop.eup %1155 }
  0x80   :  { %v361_v7 = vmul.f32 %v1156_v58, %v1129_v57  ;;  %v1158_v13 = vpop.eup %1157 }
  0x81   :  { %v362_v17 = vmul.f32 %v1158_v13, %v1130_v9 }
  0x82   :  { %v365_v16 = vsel %vm202_vm0, %v361_v7, 0.0 }
  0x83   :  { %v368_v18 = vsel %vm202_vm0, %v362_v17, 0.0 }
  0xfe   :  { %v271_v22 = vpop.xlane.xlu0 %270  ;;  %v277_v23 = vpop.xlane.xlu1 %276 }
  0xff   :  { %vm281_vm1 = vcmp.eq.f32.partialorder %v1552_v2, %v271_v22  ;;  %vm283_vm2 = vcmp.eq.f32.partialorder %v1554_v3, %v277_v23  ;;  %v188_v22 = vmul.f32 10.0, %v124_v20  ;;  %v125_v23 = vld [vmem:[#allocation7 + $0x18] sm:$0xff] }
 0x100   :  { %v285_v25 = vsel %vm281_vm1, %v1585_v21, 16  ;;  %v287_v26 = vsel %vm283_vm2, %v1585_v21, 16 }
 0x101   :  { %v1592_v27 = vsel %vm202_vm0, %v285_v25, 2147483647  ;;  %v1595_v28 = vsel %vm202_vm0, %v287_v26, 2147483647  ;;  %v764_v25 = vunpack.c.l.s4 %v1385_v24  ;;  %v194_v26 = vmul.f32 1.442695, %v188_v22 }
 0x102   :  { %v274_v29 = vpop.xlane.xlu0 %273  ;;  %v280_v30 = vpop.xlane.xlu1 %279  ;;  %v291_v31 = vshra.s32 %v1592_v27, 16  ;;  %v321_v32 = vshra.s32 %v1595_v28, 16  ;;  %v290_v39 = vand.u32 65535, %v1592_v27 }
 0x103   :  { %vm282_vm3 = vcmp.eq.f32.partialorder %v1556_v4, %v274_v29  ;;  %vm284_vm4 = vcmp.eq.f32.partialorder %v1558_v5, %v280_v30  ;;  %v189_v29 = vmul.f32 10.0, %v125_v23  ;;  %v1662_v30 = vshrl.u32 %v267_v19, 7 }
 0x104   :  { %v286_v34 = vsel %vm282_vm3, %v1585_v21, 16  ;;  %v288_v35 = vsel %vm284_vm4, %v1585_v21, 16  ;;  %v1603_v36 = vcvt.s32.f32 %v291_v31  ;;  %v1613_v43 = vcvt.s32.f32 %v321_v32  ;;  %v1667_v32 = vld [vmem:[%s2117_s7] sm:$0x3] }
 0x105   :  { %v1606_v37 = vsel %vm202_vm0, %v286_v34, 2147483647  ;;  %v1609_v38 = vsel %vm202_vm0, %v288_v35, 2147483647  ;;  %v765_v31 = vunpack.c.0.s8 %v764_v25  ;;  %1159 = vpow2.f32 %v194_v26 }
 0x106   :  { %294 = vmin.xlane.f32.xlu0 %v1603_v36  ;;  %v550_v40 = vpop.xlane.xlu0 %549  ;;  %v306_v41 = vshra.s32 %v1606_v37, 16  ;;  %v553_v42 = vpop.xlane.xlu1 %552  ;;  %v336_v44 = vshra.s32 %v1609_v38, 16  ;;  %v196_v33 = vmul.f32 1.442695, %v189_v29  ;;  %v160_v34 = vunpack.c.l.bf16 %v1667_v32 }
 0x107   :  { %vm560_vm5 = vcmp.eq.f32.partialorder %v1568_v10, %v550_v40  ;;  %vm561_vm6 = vcmp.eq.f32.partialorder %v1570_v11, %v553_v42  ;;  %v768_v35 = vsub.s32 %v765_v31, %v1662_v30  ;;  %v1138_v40 = vld [vmem:[#allocation11 + $0x8] sm:$0xff]   ;;  %v320_v42 = vand.u32 65535, %v1595_v28 }
 0x108   :  { %v564_v46 = vsel %vm560_vm5, %v1585_v21, 16  ;;  %v1619_v47 = vcvt.s32.f32 %v306_v41  ;;  %v565_v48 = vsel %vm561_vm6, %v1585_v21, 16  ;;  %v1630_v53 = vcvt.s32.f32 %v336_v44  ;;  %v1677_v41 = vld [vmem:[%s2117_s7 + $0x2] sm:$0x3] }
 0x109   :  { %v1623_v50 = vsel %vm202_vm0, %v564_v46, 2147483647  ;;  %v1626_v51 = vsel %vm202_vm0, %v565_v48, 2147483647  ;;  %1161 = vpow2.f32 %v196_v33  ;;  %v769_v19 = vrot.slane %v160_v34, %v768_v35 }
 0x10a   :  { %309 = vmin.xlane.f32.xlu1 %v1619_v47  ;;  %324 = vmin.xlane.f32.xlu0 %v1613_v43  ;;  %v556_v52 = vpop.xlane.xlu0 %555  ;;  %v559_v54 = vpop.xlane.xlu1 %558  ;;  %v570_v55 = vshra.s32 %v1623_v50, 16  ;;  %v585_v56 = vshra.s32 %v1626_v51, 16  ;;  %v305_v44 = vand.u32 65535, %v1606_v37  ;;  %v1133_v45 = vunpack.c.l.bf16 %v1138_v40 }
 0x10b   :  { %vm562_vm7 = vcmp.eq.f32.partialorder %v1576_v14, %v556_v52  ;;  %vm563_vm8 = vcmp.eq.f32.partialorder %v1578_v15, %v559_v54  ;;  %v292_v49 = vcvt.s32.f32 %v290_v39  ;;  %v1683_v52 = vrot.slane %v769_v19, %v768_v35 }
 0x10c   :  { %v566_v59 = vsel %vm562_vm7, %v1585_v21, 16  ;;  %v567_v60 = vsel %vm563_vm8, %v1585_v21, 16  ;;  %v1638_v61 = vcvt.s32.f32 %v570_v55  ;;  %v1648_v0 = vcvt.s32.f32 %v585_v56 }
 0x10d   :  { %v1641_v62 = vsel %vm202_vm0, %v566_v59, 2147483647  ;;  %v1644_v63 = vsel %vm202_vm0, %v567_v60, 2147483647  ;;  %v770_v27 = vcombine.high %v769_v19, %v769_v19  ;;  %v161_v54 = vunpack.c.l.bf16 %v1677_v41 }
 0x10e   :  { %339 = vmin.xlane.f32.xlu1 %v1630_v53  ;;  %573 = vmin.xlane.f32.xlu0 %v1638_v61  ;;  %v600_v1 = vshra.s32 %v1641_v62, 16  ;;  %v615_v6 = vshra.s32 %v1644_v63, 16  ;;  %v322_v56 = vcvt.s32.f32 %v320_v42  ;;  %v307_v57 = vcvt.s32.f32 %v305_v44 }
 0x10f   :  { %v1160_v46 = vpop.eup %1159  ;;  %v335_v28 = vand.u32 65535, %v1609_v38  ;;  %v1134_v58 = vunpack.c.h.bf16 %v1138_v40  ;;  %vm819_vm10 = vcmp.gt.f32.partialorder %v1683_v52, 0.0  ;;  %v1703_v9 = vsub.s32 0, %v1662_v30 }
 0x110   :  { %v1652_v8 = vcvt.s32.f32 %v600_v1  ;;  %v1656_v12 = vcvt.s32.f32 %v615_v6  ;;  %v363_v37 = vmul.f32 %v1160_v46, %v1133_v45  ;;  %v1694_v1 = vrot.slane %v770_v27, %v768_v35 }
 0x111   :  { %v793_v6 = vrot.slane %v161_v54, %v768_v35  ;;  %v337_v13 = vcvt.s32.f32 %v335_v28  ;;  %v569_v17 = vand.u32 65535, %v1623_v50  ;;  %v584_v29 = vand.u32 65535, %v1626_v51 }
 0x112   :  { %588 = vmin.xlane.f32.xlu1 %v1648_v0  ;;  %603 = vmin.xlane.f32.xlu0 %v1652_v8  ;;  %vm820_vm13 = vcmp.gt.f32.partialorder %v1694_v1, 0.0  ;;  %v614_v46 = vand.u32 65535, %v1644_v63  ;;  %v163_v44 = vmul.f32 10.0, %v1570_v11 }
 0x113   :  { %v801_v23 = vrot.slane %v793_v6, %v768_v35  ;;  %v794_v24 = vcombine.high %v793_v6, %v793_v6  ;;  %v571_v50 = vcvt.s32.f32 %v569_v17 }
 0x115   :  { %vm823_vm1 = vcmp.gt.f32.partialorder %v801_v23, 0.0  ;;  %v1726_v19 = vrot.slane %v794_v24, %v768_v35  ;;  %v809_v28 = vcombine.high %v801_v23, %v801_v23  ;;  %v162_v24 = vmul.f32 10.0, %v1568_v10 }
 0x116   :  { %618 = vmin.xlane.f32.xlu1 %v1656_v12  ;;  %366 = vadd.xlane.f32.xlu0 %v365_v16  ;;  %v371_v16 = vsel %vm202_vm0, %v363_v37, 0.0 }
 0x117   :  { %vm824_vm5 = vcmp.gt.f32.partialorder %v1726_v19, 0.0 }
 0x11a   :  { %369 = vadd.xlane.f32.xlu1 %v368_v18  ;;  %v1386_v18 = vmov 0  }
 0x11b   :  { %v827_v20 = vsel %vm819_vm10, 1, %v1386_v18  ;;  %v828_v31 = vsel %vm820_vm13, 1, %v1386_v18  ;;  %v832_v63 = vsel %vm824_vm5, 1, %v1386_v18  ;;  %vm825_vm10 = vcmp.gt.f32.partialorder %v809_v28, 0.0 }
 0x11c   :  { %v838_v26 = vrot.slane %v827_v20, %v1703_v9  ;;  %v842_v51 = vrot.slane %v828_v31, %v1703_v9 }
 0x11e   :  { %vm1728_vm2 = vcmp.eq.s32.totalorder %v838_v26, 1  ;;  %vm1747_vm6 = vcmp.eq.s32.totalorder %v842_v51, 1  ;;  %v164_v51 = vmul.f32 10.0, %v1576_v14 }
 0x11f   :  { %v875_v27 = vsel %vm1728_vm2, %v1568_v10, -1e+30  ;;  %v876_v37 = vsel %vm1728_vm2, %v1570_v11, -1e+30  ;;  %v878_v17 = vsel %vm1747_vm6, %v1570_v11, -1e+30 }
 0x193   :  { %v1681_v48 = vpop.xlane.xlu0 %294 }
 0x194   :  { %vm296_vm9 = vcmp.eq.f32.partialorder %v1603_v36, %v1681_v48  ;;  %v1162_v36 = vpop.eup %1161 }
 0x195   :  { %v297_v55 = vsel %vm296_vm9, %v292_v49, inf  ;;  %v785_v49 = vcombine.high %v1683_v52, %v1683_v52  ;;  %v616_v52 = vcvt.s32.f32 %v614_v46 }
 0x196   :  { %298 = vmin.xlane.f32.xlu0 %v297_v55 }
 0x197   :  { %v1689_v59 = vpop.xlane.xlu1 %309  ;;  %v1691_v60 = vpop.xlane.xlu0 %324  ;;  %vm821_vm8 = vcmp.gt.f32.partialorder %v785_v49, 0.0 }
 0x198   :  { %vm311_vm11 = vcmp.eq.f32.partialorder %v1619_v47, %v1689_v59  ;;  %vm326_vm12 = vcmp.eq.f32.partialorder %v1613_v43, %v1691_v60  ;;  %v364_v43 = vmul.f32 %v1162_v36, %v1134_v58  ;;  %v877_v58 = vsel %vm1747_vm6, %v1568_v10, -1e+30 }
 0x199   :  { %v312_v38 = vsel %vm311_vm11, %v307_v57, inf  ;;  %v327_v7 = vsel %vm326_vm12, %v322_v56, inf  ;;  %v891_v57 = vsel %vm202_vm0, %v875_v27, -inf }
 0x19a   :  { %313 = vmin.xlane.f32.xlu1 %v312_v38  ;;  %328 = vmin.xlane.f32.xlu0 %v327_v7  ;;  %v374_v40 = vsel %vm202_vm0, %v364_v43, 0.0  ;;  %v829_v38 = vsel %vm821_vm8, 1, %v1386_v18  ;;  %v786_v7 = vcombine.high %v1694_v1, %v1694_v1  ;;  %v833_v1 = vsel %vm825_vm10, 1, %v1386_v18  ;;  %v121_v43 = vld [vmem:[#allocation5 + $0x18] sm:$0xff] }
 0x19b   :  { %v1708_v22 = vpop.xlane.xlu1 %339  ;;  %v1710_v47 = vpop.xlane.xlu0 %573  ;;  %v846_v23 = vrot.slane %v829_v38, %v1703_v9 }
 0x19c   :  { %vm341_vm14 = vcmp.eq.f32.partialorder %v1630_v53, %v1708_v22  ;;  %vm575_vm15 = vcmp.eq.f32.partialorder %v1638_v61, %v1710_v47  ;;  %v599_v53 = vand.u32 65535, %v1641_v62  ;;  %v586_v61 = vcvt.s32.f32 %v584_v29 }
 0x19d   :  { %v342_v25 = vsel %vm341_vm14, %v337_v13, inf  ;;  %v576_v42 = vsel %vm575_vm15, %v571_v50, inf  ;;  %v831_v62 = vsel %vm823_vm1, 1, %v1386_v18  ;;  %v894_v13 = vsel %vm202_vm0, %v876_v37, -inf }
 0x19e   :  { %343 = vmin.xlane.f32.xlu1 %v342_v25  ;;  %372 = vadd.xlane.f32.xlu0 %v371_v16  ;;  %v601_v45 = vcvt.s32.f32 %v599_v53  ;;  %v854_v56 = vrot.slane %v831_v62, %v1703_v9  ;;  %v897_v16 = vsel %vm202_vm0, %v877_v58, -inf  ;;  %vm822_vm12 = vcmp.gt.f32.partialorder %v786_v7, 0.0  ;;  %v120_v58 = vld [vmem:[#allocation5 + $0x10] sm:$0xff] }
 0x19f   :  { %v1720_v33 = vpop.xlane.xlu1 %588  ;;  %v1722_v39 = vpop.xlane.xlu0 %603  ;;  %v900_v25 = vsel %vm202_vm0, %v878_v17, -inf  ;;  %v810_v50 = vcombine.high %v1726_v19, %v1726_v19  ;;  %vm1795_vm13 = vcmp.eq.s32.totalorder %v846_v23, 1  ;;  %v862_v53 = vrot.slane %v833_v1, %v1703_v9 }
 0x1a0   :  { %vm590_vm3 = vcmp.eq.f32.partialorder %v1648_v0, %v1720_v33  ;;  %vm605_vm4 = vcmp.eq.f32.partialorder %v1652_v8, %v1722_v39  ;;  %vm1762_vm9 = vcmp.eq.s32.totalorder %v854_v56, 1  ;;  %v166_v19 = vmul.f32 1.442695, %v162_v24 }
 0x1a1   :  { %v591_v0 = vsel %vm590_vm3, %v586_v61, inf  ;;  %v606_v55 = vsel %vm605_vm4, %v601_v45, inf  ;;  %v883_v20 = vsel %vm1762_vm9, %v1576_v14, -1e+30  ;;  %v884_v29 = vsel %vm1762_vm9, %v1578_v15, -1e+30 }
 0x1a2   :  { %375 = vadd.xlane.f32.xlu1 %v374_v40  ;;  %577 = vmin.xlane.f32.xlu0 %v576_v42  ;;  %v915_v26 = vsel %vm202_vm0, %v883_v20, -inf  ;;  %v830_v42 = vsel %vm822_vm12, 1, %v1386_v18  ;;  %v918_v61 = vsel %vm202_vm0, %v884_v29, -inf  ;;  %vm826_vm14 = vcmp.gt.f32.partialorder %v810_v50, 0.0  ;;  %v118_v45 = vld [vmem:[#allocation5] sm:$0xff] }
 0x1a3   :  { %v1738_v35 = vpop.xlane.xlu1 %618  ;;  %v879_v49 = vsel %vm1795_vm13, %v1568_v10, -1e+30  ;;  %v850_v27 = vrot.slane %v830_v42, %v1703_v9  ;;  %vm1812_vm15 = vcmp.eq.s32.totalorder %v862_v53, 1  ;;  %v165_v8 = vmul.f32 10.0, %v1578_v15 }
 0x1a4   :  { %vm620_vm7 = vcmp.eq.f32.partialorder %v1656_v12, %v1738_v35  ;;  %v858_v12 = vrot.slane %v832_v63, %v1703_v9  ;;  %v834_v56 = vsel %vm826_vm14, 1, %v1386_v18  ;;  %1163 = vpow2.f32 %v166_v19 }
 0x1a5   :  { %v621_v6 = vsel %vm620_vm7, %v616_v52, inf  ;;  %v170_v63 = vmul.f32 1.442695, %v164_v51  ;;  %v119_v52 = vld [vmem:[#allocation5 + $0x8] sm:$0xff]  ;;  %v903_v37 = vsel %vm202_vm0, %v879_v49, -inf  ;;  %vm1826_vm1 = vcmp.eq.s32.totalorder %v850_v27, 1 }
 0x1a6   :  { %592 = vmin.xlane.f32.xlu1 %v591_v0  ;;  %607 = vmin.xlane.f32.xlu0 %v606_v55  ;;  %vm1778_vm11 = vcmp.eq.s32.totalorder %v858_v12, 1  ;;  %v168_v55 = vmul.f32 1.442695, %v163_v44  ;;  %v887_v36 = vsel %vm1812_vm15, %v1576_v14, -1e+30  ;;  %v866_v18 = vrot.slane %v834_v56, %v1703_v9 }
 0x1a7   :  { %v885_v31 = vsel %vm1778_vm11, %v1576_v14, -1e+30  ;;  %v886_v46 = vsel %vm1778_vm11, %v1578_v15, -1e+30  ;;  %v172_v38 = vmul.f32 1.442695, %v165_v8 }
 0x1a8   :  { %v921_v62 = vsel %vm202_vm0, %v885_v31, -inf  ;;  %v924_v28 = vsel %vm202_vm0, %v886_v46, -inf  ;;  %1165 = vpow2.f32 %v168_v55  ;;  %v175_v7 = vmul.f32 10.0, %v119_v52 }
 0x1a9   :  { %1167 = vpow2.f32 %v170_v63  ;;  %v927_v20 = vsel %vm202_vm0, %v887_v36, -inf  ;;  %v888_v23 = vsel %vm1812_vm15, %v1578_v15, -1e+30  ;;  %v881_v9 = vsel %vm1826_vm1, %v1568_v10, -1e+30 }
 0x1aa   :  { %622 = vmin.xlane.f32.xlu1 %v621_v6  ;;  %892 = vmax.xlane.f32.xlu0 %v891_v57  ;;  %v174_v57 = vmul.f32 10.0, %v118_v45  ;;  %v880_v6 = vsel %vm1795_vm13, %v1570_v11, -1e+30  ;;  %vm1839_vm2 = vcmp.eq.s32.totalorder %v866_v18, 1  ;;  %1169 = vpow2.f32 %v172_v38 }
 0x1ab   :  { %v906_v17 = vsel %vm202_vm0, %v880_v6, -inf  ;;  %v180_v24 = vmul.f32 1.442695, %v175_v7  ;;  %v930_v50 = vsel %vm202_vm0, %v888_v23, -inf  ;;  %v909_v29 = vsel %vm202_vm0, %v881_v9, -inf }
 0x1ac   :  { %v882_v10 = vsel %vm1826_vm1, %v1570_v11, -1e+30  ;;  %v889_v40 = vsel %vm1839_vm2, %v1576_v14, -1e+30  ;;  %v890_v19 = vsel %vm1839_vm2, %v1578_v15, -1e+30 }
 0x1ad   :  { %v912_v44 = vsel %vm202_vm0, %v882_v10, -inf  ;;  %v933_v51 = vsel %vm202_vm0, %v889_v40, -inf  ;;  %v936_v14 = vsel %vm202_vm0, %v890_v19, -inf  ;;  %v1136_v15 = vld [vmem:[#allocation10 + $0x8] sm:$0xff]   ;;  %vm390_vm3 = vcmask 130112  }
 0x1ae   :  { %895 = vmax.xlane.f32.xlu1 %v894_v13  ;;  %898 = vmax.xlane.f32.xlu0 %v897_v16  ;;  %v178_v13 = vmul.f32 1.442695, %v174_v57  ;;  %v176_v16 = vmul.f32 10.0, %v120_v58  ;;  %v1164_v31 = vpop.eup %1163  ;;  %v1117_v56 = vunpack.c.l.bf16 %v1136_v15  ;;  %v1120_v58 = vld [vmem:[%s2115_s5] sm:$0xff]   ;;  %v1118_v36 = vunpack.c.h.bf16 %v1136_v15 }
 0x1af   :  { %v198_v11 = vmul.f32 %v1164_v31, %v1552_v2  ;;  %v1121_v12 = vunpack.c.l.bf16 %v1120_v58  ;;  %vm1035_vm12 = vcmask 125952   ;;  %vm402_vm13 = vcmask 1042434  }
 0x1b0   :  { %1171 = vpow2.f32 %v178_v13  ;;  %vm404_vm14 = vcmask 1043459  }
 0x1b1   :  { %1173 = vpow2.f32 %v180_v24  ;;  %v203_v49 = vsel %vm202_vm0, %v198_v11, 0.0 }
 0x1b2   :  { %901 = vmax.xlane.f32.xlu1 %v900_v25  ;;  %916 = vmax.xlane.f32.xlu0 %v915_v26  ;;  %v177_v25 = vmul.f32 10.0, %v121_v43  ;;  %v182_v26 = vmul.f32 1.442695, %v176_v16  ;;  %v1166_v42 = vpop.eup %1165  ;;  %v231_v43 = vmul.f32 %v1164_v31, %v1121_v12  ;;  %v346_v12 = vcvt.f32.s32 %v1708_v22 }
 0x1b3   :  { %v199_v46 = vmul.f32 %v1166_v42, %v1556_v4 }
 0x1b4   :  { %v184_v53 = vmul.f32 1.442695, %v177_v25  ;;  %1175 = vpow2.f32 %v182_v26 }
 0x1b5   :  { %v206_v52 = vsel %vm202_vm0, %v199_v46, 0.0  ;;  %v1883_v46 = vsub.s32 %v1585_v21, %v1662_v30 }
 0x1b6   :  { %919 = vmax.xlane.f32.xlu1 %v918_v61  ;;  %922 = vmax.xlane.f32.xlu0 %v921_v62  ;;  %v1168_v61 = vpop.eup %1167  ;;  %v1112_v62 = vld [vmem:[#allocation10] sm:$0xff]   ;;  %1177 = vpow2.f32 %v184_v53 }
 0x1b7   :  { %v1170_v45 = vpop.eup %1169  ;;  %v200_v27 = vmul.f32 %v1168_v61, %v1554_v3  ;;  %v1113_v0 = vunpack.c.l.bf16 %v1112_v62  ;;  %v1114_v8 = vunpack.c.h.bf16 %v1112_v62  ;;  %v367_v62 = vpop.xlane.xlu0 %366 }
 0x1b8   :  { %v201_v57 = vmul.f32 %v1170_v45, %v1558_v5 }
 0x1ba   :  { %925 = vmax.xlane.f32.xlu1 %v924_v28  ;;  %904 = vmax.xlane.f32.xlu0 %v903_v37  ;;  %v1172_v55 = vpop.eup %1171  ;;  %v209_v28 = vsel %vm202_vm0, %v200_v27, 0.0  ;;  %v212_v18 = vsel %vm202_vm0, %v201_v57, 0.0  ;;  %v370_v27 = vpop.xlane.xlu1 %369 }
 0x1bb   :  { %v1174_v63 = vpop.eup %1173  ;;  %v215_v37 = vmul.f32 %v1172_v55, %v1113_v0  ;;  %v316_v0 = vcvt.f32.s32 %v1689_v59 }
 0x1bc   :  { %v216_v38 = vmul.f32 %v1174_v63, %v1114_v8  ;;  %v331_v63 = vcvt.f32.s32 %v1691_v60  ;;  %v1387_v60 = vmov 0.0  }
 0x1bd   :  { %v219_v7 = vsel %vm202_vm0, %v215_v37, 0.0  ;;  %v317_v37 = vshll.u32 %v316_v0, 16 }
 0x1be   :  { %907 = vmax.xlane.f32.xlu1 %v906_v17  ;;  %928 = vmax.xlane.f32.xlu0 %v927_v20  ;;  %v1176_v6 = vpop.eup %1175  ;;  %v1137_v17 = vld [vmem:[%s2115_s5 + $0x8] sm:$0xff]   ;;  %v1122_v20 = vunpack.c.h.bf16 %v1120_v58  ;;  %v222_v23 = vsel %vm202_vm0, %v216_v38, 0.0  ;;  %v332_v38 = vshll.u32 %v331_v63, 16  ;;  %s1388_s5 = smov [#allocation13]  }
 0x1bf   :  { %v217_v13 = vmul.f32 %v1176_v6, %v1117_v56  ;;  %v1125_v24 = vunpack.c.l.bf16 %v1137_v17  ;;  %s1074_s27 = sshll.u32 %s1388_s5, 4  ;;  %s2053_s27 = int_to_ptr.vmem [resolvable:$true] %s1074_s27 }
 0x1c0   :  { %v1178_v16 = vpop.eup %1177  ;;  %v232_v25 = vmul.f32 %v1166_v42, %v1122_v20  ;;  %s1343_s28 = scalar_lea.vmem %s2053_s27, 32  ;;  %p1348_p7 = scmp.lt.s32.totalorder %s2053_s27, %s2053_s27 }
 0x1c1   :  { %v218_v9 = vmul.f32 %v1178_v16, %v1118_v36  ;;  %v225_v1 = vsel %vm202_vm0, %v217_v13, 0.0  ;;  %v233_v10 = vmul.f32 %v1168_v61, %v1125_v24  ;;  %v301_v61 = vcvt.f32.s32 %v1681_v48  ;;  %p1344_p6 = scmp.ne.s32.totalorder %s2053_s27, %s1343_s28  ;;  %p1349_p8 = scmp.lt.s32.totalorder %s1343_s28, %s1343_s28 }
 0x1c2   :  { %931 = vmax.xlane.f32.xlu1 %v930_v50  ;;  %910 = vmax.xlane.f32.xlu0 %v909_v29  ;;  %v235_v50 = vsel %vm202_vm0, %v231_v43, 0.0  ;;  %v1126_v29 = vunpack.c.h.bf16 %v1137_v17  ;;  %v238_v40 = vsel %vm202_vm0, %v232_v25, 0.0  ;;  %v384_v48 = vrot.slane %v367_v62, %v1883_v46 }
 0x1c3   :  { %v228_v26 = vsel %vm202_vm0, %v218_v9, 0.0  ;;  %v241_v53 = vsel %vm202_vm0, %v233_v10, 0.0  ;;  %v438_v19 = vadd.f32 %v238_v40, %v235_v50  ;;  %v302_v8 = vshll.u32 %v301_v61, 16  ;;  %p1350_p9 = por %p1349_p8, %p1348_p7 }
 0x1c4   :  { %v234_v31 = vmul.f32 %v1170_v45, %v1126_v29  ;;  %v347_v24 = vshll.u32 %v346_v12, 16 }
 0x1c5   :  { %v439_v11 = vrot.slane %v438_v19, 4  ;;  %p1351_p10 = pnand %p1350_p9, %p1344_p6 }
 0x1c6   :  { %913 = vmax.xlane.f32.xlu1 %v912_v44  ;;  %934 = vmax.xlane.f32.xlu0 %v933_v51  ;;  %v244_v44 = vsel %vm202_vm0, %v234_v31, 0.0  ;;  %v385_v51 = vadd.s32 4294967288, %v1585_v21 }
 0x1c7   :  { %v445_v42 = vadd.f32 %v244_v44, %v241_v53 }
 0x1c8   :  { %v1886_v45 = vsub.s32 %v385_v51, %v1662_v30 }
 0x1ca   :  { %937 = vmax.xlane.f32.xlu1 %v936_v14  ;;  %204 = vadd.xlane.f32.xlu0 %v203_v49  ;;  %v446_v14 = vrot.slane %v445_v42, 4  ;;  %v440_v49 = vadd.f32 %v439_v11, %v438_v19  ;;  %v389_v57 = vrot.slane %v370_v27, %v1886_v45 }
 0x1cc   :  { %v447_v15 = vadd.f32 %v446_v14, %v445_v42  ;;  %v391_v16 = vsel %vm390_vm3, %v389_v57, %v384_v48 }
 0x1ce   :  { %207 = vadd.xlane.f32.xlu1 %v206_v52  ;;  %210 = vadd.xlane.f32.xlu0 %v209_v28  ;;  %v441_v52 = vrot.slane %v440_v49, 2  ;;  %v448_v58 = vrot.slane %v447_v15, 2 }
 0x1d0   :  { %v449_v43 = vadd.f32 %v448_v58, %v447_v15  ;;  %v580_v15 = vcvt.f32.s32 %v1710_v47  ;;  %v610_v47 = vcvt.f32.s32 %v1722_v39 }
 0x1d2   :  { %213 = vadd.xlane.f32.xlu1 %v212_v18  ;;  %220 = vadd.xlane.f32.xlu0 %v219_v7  ;;  %v442_v7 = vadd.f32 %v441_v52, %v440_v49  ;;  %v450_v42 = vrot.slane %v449_v43, 1 }
 0x1d6   :  { %223 = vadd.xlane.f32.xlu1 %v222_v23  ;;  %226 = vadd.xlane.f32.xlu0 %v225_v1 }
 0x1da   :  { %229 = vadd.xlane.f32.xlu1 %v228_v26  ;;  %236 = vadd.xlane.f32.xlu0 %v235_v50  ;;  %v443_v50 = vrot.slane %v442_v7, 1 }
 0x1dc   :  { %v444_v11 = vadd.f32 %v443_v50, %v442_v7 }
 0x1de   :  { %239 = vadd.xlane.f32.xlu1 %v238_v40  ;;  %242 = vadd.xlane.f32.xlu0 %v241_v53 }
 0x1e2   :  { %245 = vadd.xlane.f32.xlu1 %v244_v44 }
 0x223   :  { %v299_v55 = vpop.xlane.xlu0 %298 }
 0x224   :  { %v300_v56 = vcvt.f32.s32 %v299_v55  ;;  %v595_v55 = vcvt.f32.s32 %v1720_v33  ;;  %v625_v33 = vcvt.f32.s32 %v1738_v35 }
 0x226   :  { %v303_v28 = vadd.s32 %v302_v8, %v300_v56  ;;  %v451_v8 = vadd.f32 %v450_v42, %v449_v43 }
 0x227   :  { %v314_v6 = vpop.xlane.xlu1 %313  ;;  %v329_v36 = vpop.xlane.xlu0 %328 }
 0x228   :  { %v315_v59 = vcvt.f32.s32 %v314_v6  ;;  %v330_v18 = vcvt.f32.s32 %v329_v36  ;;  %vm349_vm4 = vcmp.eq.s32.totalorder %v1585_v21, %v303_v28  ;;  %v581_v6 = vshll.u32 %v580_v15, 16 }
 0x229   :  { %v1091_v13 = vsel %vm349_vm4, 1.0, %v1387_v60  ;;  %v596_v36 = vshll.u32 %v595_v55, 16  ;;  %vm1064_vm4 = vcmask 24576  }
 0x22a   :  { %v318_v17 = vadd.s32 %v317_v37, %v315_v59  ;;  %v422_v20 = vmul.f32 %v1091_v13, %v391_v16  ;;  %v333_v23 = vadd.s32 %v332_v38, %v330_v18  ;;  %v452_v48 = vmul.f32 %v1091_v13, %v444_v11 }
 0x22b   :  { %v344_v9 = vpop.xlane.xlu1 %343  ;;  %v373_v1 = vpop.xlane.xlu0 %372 }
 0x22c   :  { %v345_v25 = vcvt.f32.s32 %v344_v9  ;;  %v426_v22 = vsel %vm202_vm0, %v422_v20, 0.0  ;;  %vm350_vm5 = vcmp.eq.s32.totalorder %v1585_v21, %v318_v17  ;;  %v395_v10 = vrot.slane %v373_v1, %v1883_v46 }
 0x22d   :  { %427 = vadd.xlane.f32.xlu0 %v426_v22  ;;  %v1092_v26 = vsel %vm350_vm5, 1.0, %v1387_v60  ;;  %vm351_vm6 = vcmp.eq.s32.totalorder %v1585_v21, %v333_v23  ;;  %v456_v59 = vsel %vm202_vm0, %v452_v48, 0.0  ;;  %v611_v23 = vshll.u32 %v610_v47, 16 }
 0x22e   :  { %v348_v29 = vadd.s32 %v347_v24, %v345_v25  ;;  %v423_v40 = vmul.f32 %v1092_v26, %v391_v16  ;;  %v1093_v14 = vsel %vm351_vm6, 1.0, %v1387_v60  ;;  %v453_v52 = vmul.f32 %v1092_v26, %v444_v11 }
 0x22f   :  { %v376_v31 = vpop.xlane.xlu1 %375  ;;  %v578_v53 = vpop.xlane.xlu0 %577  ;;  %v454_v38 = vmul.f32 %v1093_v14, %v451_v8  ;;  %v626_v9 = vshll.u32 %v625_v33, 16  ;;  %v491_v1 = vsel %vm202_vm0, %v1556_v4, 0.0  ;;  %v488_v24 = vsel %vm202_vm0, %v1552_v2, 0.0 }
 0x230   :  { %v399_v44 = vrot.slane %v376_v31, %v1886_v45  ;;  %v429_v19 = vsel %vm202_vm0, %v423_v40, 0.0  ;;  %vm352_vm7 = vcmp.eq.s32.totalorder %v1585_v21, %v348_v29  ;;  %v579_v57 = vcvt.f32.s32 %v578_v53 }
 0x231   :  { %430 = vadd.xlane.f32.xlu1 %v429_v19  ;;  %v1094_v51 = vsel %vm352_vm7, 1.0, %v1387_v60  ;;  %v459_v12 = vsel %vm202_vm0, %v453_v52, 0.0  ;;  %v462_v35 = vsel %vm202_vm0, %v454_v38, 0.0  ;;  %v497_v31 = vsel %vm202_vm0, %v1558_v5, 0.0 }
 0x232   :  { %v400_v62 = vsel %vm390_vm3, %v399_v44, %v395_v10  ;;  %v455_v18 = vmul.f32 %v1094_v51, %v451_v8  ;;  %v582_v7 = vadd.s32 %v581_v6, %v579_v57  ;;  %v494_v53 = vsel %vm202_vm0, %v1554_v3, 0.0 }
 0x233   :  { %v593_v61 = vpop.xlane.xlu1 %592  ;;  %v608_v49 = vpop.xlane.xlu0 %607  ;;  %v425_v27 = vmul.f32 %v1094_v51, %v400_v62  ;;  %v424_v0 = vmul.f32 %v1093_v14, %v400_v62  ;;  %v1042_v57 = vsel %vm1035_vm12, %v160_v34, 0.0  ;;  %vm675_vm7 = vcmp.eq.s32.totalorder %v1662_v30, 1 }
 0x234   :  { %v594_v28 = vcvt.f32.s32 %v593_v61  ;;  %v609_v16 = vcvt.f32.s32 %v608_v49  ;;  %v465_v39 = vsel %vm202_vm0, %v455_v18, 0.0  ;;  %vm628_vm9 = vcmp.eq.s32.totalorder %v1585_v21, %v582_v7 }
 0x235   :  { %v435_v56 = vsel %vm202_vm0, %v425_v27, 0.0  ;;  %v432_v63 = vsel %vm202_vm0, %v424_v0, 0.0  ;;  %v1095_v10 = vsel %vm628_vm9, 1.0, %v1387_v60 }
 0x236   :  { %436 = vadd.xlane.f32.xlu1 %v435_v56  ;;  %433 = vadd.xlane.f32.xlu0 %v432_v63  ;;  %v597_v13 = vadd.s32 %v596_v36, %v594_v28  ;;  %v612_v25 = vadd.s32 %v611_v23, %v609_v16  ;;  %v640_v42 = vmul.f32 %v1552_v2, %v1095_v10  ;;  %v1045_v28 = vsel %vm1035_vm12, %v161_v54, 0.0 }
 0x237   :  { %v623_v37 = vpop.xlane.xlu1 %622  ;;  %v1911_v58 = vpop.xlane.xlu0 %892 }
 0x238   :  { %v624_v17 = vcvt.f32.s32 %v623_v37  ;;  %vm629_vm8 = vcmp.eq.s32.totalorder %v1585_v21, %v597_v13  ;;  %vm630_vm11 = vcmp.eq.s32.totalorder %v1585_v21, %v612_v25  ;;  %v644_v49 = vsel %vm202_vm0, %v640_v42, 0.0 }
 0x239   :  { %v1096_v29 = vsel %vm629_vm8, 1.0, %v1387_v60  ;;  %v1097_v11 = vsel %vm630_vm11, 1.0, %v1387_v60  ;;  %v958_v15 = vrot.slane %v1911_v58, %v1883_v46 }
 0x23a   :  { %460 = vadd.xlane.f32.xlu1 %v459_v12  ;;  %457 = vadd.xlane.f32.xlu0 %v456_v59  ;;  %v627_v22 = vadd.s32 %v626_v9, %v624_v17  ;;  %v641_v19 = vmul.f32 %v1556_v4, %v1096_v29 }
 0x23b   :  { %v896_v20 = vpop.xlane.xlu1 %895  ;;  %v899_v43 = vpop.xlane.xlu0 %898 }
 0x23c   :  { %vm631_vm10 = vcmp.eq.s32.totalorder %v1585_v21, %v627_v22  ;;  %v647_v61 = vsel %vm202_vm0, %v641_v19, 0.0  ;;  %v642_v21 = vmul.f32 %v1554_v3, %v1097_v11  ;;  %v962_v0 = vrot.slane %v896_v20, %v1886_v45 }
 0x23d   :  { %v1098_v51 = vsel %vm631_vm10, 1.0, %v1387_v60  ;;  %v967_v8 = vrot.slane %v899_v43, %v1883_v46 }
 0x23e   :  { %466 = vadd.xlane.f32.xlu1 %v465_v39  ;;  %463 = vadd.xlane.f32.xlu0 %v462_v35  ;;  %v643_v27 = vmul.f32 %v1558_v5, %v1098_v51  ;;  %v650_v5 = vsel %vm202_vm0, %v642_v21, 0.0  ;;  %v963_v37 = vsel %vm390_vm3, %v962_v0, %v958_v15 }
 0x23f   :  { %v902_v26 = vpop.xlane.xlu1 %901  ;;  %v1923_v50 = vpop.xlane.xlu0 %916 }
 0x240   :  { %v971_v55 = vrot.slane %v902_v26, %v1886_v45  ;;  %v653_v56 = vsel %vm202_vm0, %v643_v27, 0.0  ;;  %v994_v36 = vrot.slane %v1923_v50, %v1883_v46  ;;  %vm401_vm0 = vcmask 1041409  }
 0x242   :  { %492 = vadd.xlane.f32.xlu1 %v491_v1  ;;  %489 = vadd.xlane.f32.xlu0 %v488_v24  ;;  %v972_v58 = vsel %vm390_vm3, %v971_v55, %v967_v8 }
 0x243   :  { %v920_v40 = vpop.xlane.xlu1 %919  ;;  %v923_v44 = vpop.xlane.xlu0 %922  ;;  %v1027_v7 = vsel %vm401_vm0, %v972_v58, %v963_v37 }
 0x244   :  { %v998_v6 = vrot.slane %v920_v40, %v1886_v45  ;;  %v1003_v33 = vrot.slane %v923_v44, %v1883_v46 }
 0x246   :  { %498 = vadd.xlane.f32.xlu1 %v497_v31  ;;  %495 = vadd.xlane.f32.xlu0 %v494_v53  ;;  %v999_v38 = vsel %vm390_vm3, %v998_v6, %v994_v36 }
 0x247   :  { %v926_v62 = vpop.xlane.xlu1 %925  ;;  %v905_v14 = vpop.xlane.xlu0 %904 }
 0x248   :  { %v976_v63 = vrot.slane %v905_v14, %v1883_v46  ;;  %v1007_v47 = vrot.slane %v926_v62, %v1886_v45 }
 0x24a   :  { %648 = vadd.xlane.f32.xlu1 %v647_v61  ;;  %645 = vadd.xlane.f32.xlu0 %v644_v49  ;;  %v1008_v13 = vsel %vm390_vm3, %v1007_v47, %v1003_v33 }
 0x24b   :  { %v908_v4 = vpop.xlane.xlu1 %907  ;;  %v929_v2 = vpop.xlane.xlu0 %928  ;;  %v1030_v1 = vsel %vm401_vm0, %v1008_v13, %v999_v38 }
 0x24c   :  { %v980_v3 = vrot.slane %v908_v4, %v1886_v45  ;;  %v1012_v54 = vrot.slane %v929_v2, %v1883_v46 }
 0x24e   :  { %654 = vadd.xlane.f32.xlu1 %v653_v56  ;;  %651 = vadd.xlane.f32.xlu0 %v650_v5  ;;  %v981_v34 = vsel %vm390_vm3, %v980_v3, %v976_v63 }
 0x24f   :  { %v932_v52 = vpop.xlane.xlu1 %931  ;;  %v911_v48 = vpop.xlane.xlu0 %910  ;;  %v1028_v20 = vsel %vm402_vm13, %v981_v34, %v1027_v7 }
 0x250   :  { %v985_v32 = vrot.slane %v911_v48, %v1883_v46  ;;  %v1016_v41 = vrot.slane %v932_v52, %v1886_v45 }
 0x252   :  { %1043 = vadd.xlane.f32.xlu0 %v1042_v57  ;;  %1046 = vadd.xlane.f32.xlu1 %v1045_v28  ;;  %v1017_v43 = vsel %vm390_vm3, %v1016_v41, %v1012_v54 }
 0x253   :  { %v914_v12 = vpop.xlane.xlu1 %913  ;;  %v935_v59 = vpop.xlane.xlu0 %934  ;;  %v1031_v25 = vsel %vm402_vm13, %v1017_v43, %v1030_v1 }
 0x254   :  { %v989_v18 = vrot.slane %v914_v12, %v1886_v45  ;;  %v1021_v16 = vrot.slane %v935_v59, %v1883_v46 }
 0x256   :  { %v990_v17 = vsel %vm390_vm3, %v989_v18, %v985_v32 }
 0x257   :  { %v938_v23 = vpop.xlane.xlu1 %937  ;;  %v1029_v9 = vsel %vm404_vm14, %v990_v17, %v1028_v20  ;;  %v1985_v50 = vpop.xlane.xlu0 %204 }
 0x258   :  { %v1025_v39 = vrot.slane %v938_v23, %v1886_v45  ;;  %v1036_v35 = vsel %vm1035_vm12, %v1029_v9, 0.0 }
 0x259   :  { %1037 = vadd.xlane.f32.xlu0 %v1036_v35 }
 0x25a   :  { %v1026_v24 = vsel %vm390_vm3, %v1025_v39, %v1021_v16 }
 0x25b   :  { %v1032_v22 = vsel %vm404_vm14, %v1026_v24, %v1031_v25  ;;  %v1987_v29 = vpop.xlane.xlu1 %207  ;;  %v1989_v10 = vpop.xlane.xlu0 %210 }
 0x25c   :  { %v1039_v26 = vsel %vm1035_vm12, %v1032_v22, 0.0 }
 0x25d   :  { %1040 = vadd.xlane.f32.xlu1 %v1039_v26 }
 0x25f   :  { %v1991_v40 = vpop.xlane.xlu1 %213  ;;  %v221_v31 = vpop.xlane.xlu0 %220 }
 0x260   :  { %v247_v51 = vadd.f32 %v221_v31, %v1985_v50 }
 0x263   :  { %v224_v53 = vpop.xlane.xlu1 %223  ;;  %v227_v44 = vpop.xlane.xlu0 %226 }
 0x264   :  { %v248_v11 = vadd.f32 %v224_v53, %v1987_v29  ;;  %v249_v14 = vadd.f32 %v227_v44, %v1989_v10 }
 0x267   :  { %v230_v19 = vpop.xlane.xlu1 %229  ;;  %v237_v42 = vpop.xlane.xlu0 %236 }
 0x268   :  { %v251_v61 = vadd.f32 %v247_v51, %v237_v42  ;;  %v250_v21 = vadd.f32 %v230_v19, %v1991_v40 }
 0x26a   :  { %v255_v4 = vadd.f32 1e-08, %v251_v61 }
 0x26b   :  { %v240_v62 = vpop.xlane.xlu1 %239  ;;  %v243_v49 = vpop.xlane.xlu0 %242 }
 0x26c   :  { %v252_v27 = vadd.f32 %v248_v11, %v240_v62  ;;  %v253_v2 = vadd.f32 %v249_v14, %v243_v49  ;;  %1179 = vrcp.f32 %v255_v4 }
 0x26e   :  { %v256_v15 = vadd.f32 1e-08, %v252_v27  ;;  %v257_v8 = vadd.f32 1e-08, %v253_v2 }
 0x26f   :  { %v246_v0 = vpop.xlane.xlu1 %245 }
 0x270   :  { %v254_v55 = vadd.f32 %v250_v21, %v246_v0  ;;  %1181 = vrcp.f32 %v256_v15 }
 0x271   :  { %1183 = vrcp.f32 %v257_v8 }
 0x272   :  { %v258_v56 = vadd.f32 1e-08, %v254_v55 }
 0x274   :  { %1185 = vrcp.f32 %v258_v56 }
 0x276   :  { %v1180_v63 = vpop.eup %1179 }
 0x277   :  { %v260_v28 = vmul.f32 %v1180_v63, %v1985_v50 }
 0x279   :  { %v504_v32 = vadd.f32 1e-08, %v260_v28 }
 0x27a   :  { %v1182_v52 = vpop.eup %1181 }
 0x27b   :  { %v1184_v37 = vpop.eup %1183  ;;  %v262_v58 = vmul.f32 %v1182_v52, %v1987_v29  ;;  %1187 = vlog2.f32 %v504_v32 }
 0x27c   :  { %v264_v34 = vmul.f32 %v1184_v37, %v1989_v10 }
 0x27d   :  { %v505_v59 = vadd.f32 1e-08, %v262_v58 }
 0x27e   :  { %v1186_v41 = vpop.eup %1185  ;;  %v506_v43 = vadd.f32 1e-08, %v264_v34 }
 0x27f   :  { %v266_v20 = vmul.f32 %v1186_v41, %v1991_v40 }
 0x281   :  { %v507_v25 = vadd.f32 1e-08, %v266_v20 }
 0x285   :  { %v1188_v31 = vpop.eup %1187 }
 0x286   :  { %v509_v55 = vmul.f32 0.6931472, %v1188_v31 }
 0x288   :  { %v516_v52 = vsub.f32 0.0, %v509_v55 }
 0x2ba   :  { %v428_v3 = vpop.xlane.xlu0 %427 }
 0x2bb   :  { %v468_v6 = vadd.f32 %v428_v3, %v1985_v50 }
 0x2be   :  { %v431_v5 = vpop.xlane.xlu1 %430 }
 0x2bf   :  { %v469_v36 = vadd.f32 %v431_v5, %v1987_v29 }
 0x2c3   :  { %v437_v48 = vpop.xlane.xlu1 %436  ;;  %v434_v57 = vpop.xlane.xlu0 %433 }
 0x2c4   :  { %v471_v18 = vadd.f32 %v437_v48, %v1991_v40  ;;  %v470_v38 = vadd.f32 %v434_v57, %v1989_v10 }
 0x2c7   :  { %v461_v47 = vpop.xlane.xlu1 %460  ;;  %v458_v33 = vpop.xlane.xlu0 %457 }
 0x2c8   :  { %v473_v54 = vadd.f32 %v469_v36, %v461_v47  ;;  %v472_v12 = vadd.f32 %v468_v6, %v458_v33  ;;  %v520_v47 = vmul.f32 0.5, %v516_v52 }
 0x2ca   :  { %v477_v7 = vadd.f32 1e-08, %v473_v54  ;;  %v476_v13 = vadd.f32 1e-08, %v472_v12 }
 0x2cb   :  { %v467_v16 = vpop.xlane.xlu1 %466  ;;  %v464_v17 = vpop.xlane.xlu0 %463 }
 0x2cc   :  { %1189 = vrcp.f32 %v477_v7  ;;  %v475_v23 = vadd.f32 %v471_v18, %v467_v16  ;;  %v474_v9 = vadd.f32 %v470_v38, %v464_v17 }
 0x2cd   :  { %1191 = vrcp.f32 %v476_v13 }
 0x2ce   :  { %v479_v39 = vadd.f32 1e-08, %v475_v23  ;;  %v478_v35 = vadd.f32 1e-08, %v474_v9  ;;  %1193 = vlog2.f32 %v505_v59 }
 0x2cf   :  { %v2005_v1 = vpop.xlane.xlu1 %492  ;;  %v2007_v24 = vpop.xlane.xlu0 %489  ;;  %1195 = vlog2.f32 %v506_v43 }
 0x2d0   :  { %1197 = vrcp.f32 %v479_v39  ;;  %vm501_vm15 = vcmp.gt.f32.partialorder %v2005_v1, 0.0  ;;  %vm500_vm1 = vcmp.gt.f32.partialorder %v2007_v24, 0.0 }
 0x2d1   :  { %1199 = vrcp.f32 %v478_v35  ;;  %v1099_v48 = vsel %vm500_vm1, 1.0, %v1387_v60 }
 0x2d2   :  { %1201 = vlog2.f32 %v507_v25  ;;  %v683_v33 = vrot.slane %v1099_v48, %v1883_v46 }
 0x2d3   :  { %v2009_v22 = vpop.xlane.xlu0 %495  ;;  %v2011_v26 = vpop.xlane.xlu1 %498 }
 0x2d4   :  { %vm503_vm5 = vcmp.gt.f32.partialorder %v2011_v26, 0.0  ;;  %vm502_vm6 = vcmp.gt.f32.partialorder %v2009_v22, 0.0 }
 0x2d5   :  { %v1102_v23 = vsel %vm503_vm5, 1.0, %v1387_v60  ;;  %v1101_v9 = vsel %vm502_vm6, 1.0, %v1387_v60 }
 0x2d6   :  { %v1190_v53 = vpop.eup %1189 }
 0x2d7   :  { %v1192_v44 = vpop.eup %1191  ;;  %v483_v19 = vmul.f32 %v1190_v53, %v1987_v29  ;;  %v646_v42 = vpop.xlane.xlu0 %645 }
 0x2d8   :  { %v1194_v51 = vpop.eup %1193  ;;  %v481_v11 = vmul.f32 %v1192_v44, %v1985_v50  ;;  %v649_v27 = vpop.xlane.xlu1 %648  ;;  %v668_v18 = vsel %vm500_vm1, %v646_v42, 0.0 }
 0x2d9   :  { %v1196_v62 = vpop.eup %1195  ;;  %v525_v14 = vadd.f32 1e-08, %v483_v19  ;;  %v511_v29 = vmul.f32 0.6931472, %v1194_v51  ;;  %v669_v59 = vsel %vm501_vm15, %v649_v27, 0.0  ;;  %v709_v53 = vrot.slane %v668_v18, %v1883_v46 }
 0x2da   :  { %v1198_v61 = vpop.eup %1197  ;;  %v524_v49 = vadd.f32 1e-08, %v481_v11  ;;  %v513_v56 = vmul.f32 0.6931472, %v1196_v62  ;;  %v713_v31 = vrot.slane %v669_v59, %v1886_v45  ;;  %v696_v27 = vrot.slane %v1102_v23, %v1886_v45 }
 0x2db   :  { %v1200_v21 = vpop.eup %1199  ;;  %1203 = vlog2.f32 %v525_v14  ;;  %v487_v4 = vmul.f32 %v1198_v61, %v1991_v40  ;;  %v2017_v0 = vpop.xlane.xlu0 %651  ;;  %v517_v63 = vsub.f32 0.0, %v511_v29 }
 0x2dc   :  { %1205 = vlog2.f32 %v524_v49  ;;  %v485_v2 = vmul.f32 %v1200_v21, %v1989_v10  ;;  %v1202_v15 = vpop.eup %1201  ;;  %v655_v3 = vpop.xlane.xlu1 %654  ;;  %v1100_v10 = vsel %vm501_vm15, 1.0, %v1387_v60  ;;  %v518_v57 = vsub.f32 0.0, %v513_v56 }
 0x2dd   :  { %v527_v8 = vadd.f32 1e-08, %v487_v4  ;;  %v515_v5 = vmul.f32 0.6931472, %v1202_v15  ;;  %v521_v6 = vmul.f32 0.5, %v517_v63  ;;  %v687_v36 = vrot.slane %v1100_v10, %v1886_v45 }
 0x2de   :  { %v526_v50 = vadd.f32 1e-08, %v485_v2  ;;  %v2030_v41 = vmul.f32 0.5, %v518_v57  ;;  %v671_v51 = vsel %vm503_vm5, %v655_v3, 0.0  ;;  %v670_v14 = vsel %vm502_vm6, %v2017_v0, 0.0 }
 0x2df   :  { %1207 = vlog2.f32 %v527_v8  ;;  %v1044_v40 = vpop.xlane.xlu0 %1043  ;;  %v519_v28 = vsub.f32 0.0, %v515_v5  ;;  %v688_v43 = vsel %vm390_vm3, %v687_v36, %v683_v33  ;;  %v692_v4 = vrot.slane %v1101_v9, %v1883_v46 }
 0x2e0   :  { %1209 = vlog2.f32 %v526_v50  ;;  %vm1048_vm2 = vcmp.gt.f32.partialorder %v1044_v40, 0.0  ;;  %v1047_v37 = vpop.xlane.xlu1 %1046  ;;  %v714_v29 = vsel %vm390_vm3, %v713_v31, %v709_v53  ;;  %v722_v55 = vrot.slane %v671_v51, %v1886_v45 }
 0x2e1   :  { %v523_v13 = vmul.f32 0.5, %v519_v28  ;;  %vm1049_vm8 = vcmp.gt.f32.partialorder %v1047_v37, 0.0  ;;  %v718_v50 = vrot.slane %v670_v14, %v1883_v46 }
 0x2e5   :  { %v1204_v58 = vpop.eup %1203 }
 0x2e6   :  { %v1206_v32 = vpop.eup %1205  ;;  %v531_v34 = vmul.f32 0.6931472, %v1204_v58  ;;  %v1038_v54 = vpop.xlane.xlu0 %1037 }
 0x2e7   :  { %v529_v12 = vmul.f32 0.6931472, %v1206_v32  ;;  %v1050_v38 = vsel %vm1048_vm2, %v1038_v54, -1e+30 }
 0x2e8   :  { %v537_v7 = vsub.f32 0.0, %v531_v34  ;;  %v1057_v16 = vrot.slane %v1050_v38, %v1883_v46 }
 0x2e9   :  { %v1208_v17 = vpop.eup %1207  ;;  %v536_v20 = vsub.f32 0.0, %v529_v12 }
 0x2ea   :  { %v1210_v39 = vpop.eup %1209  ;;  %v541_v35 = vmul.f32 0.5, %v537_v7  ;;  %v535_v25 = vmul.f32 0.6931472, %v1208_v17  ;;  %1065 = vst.msk [vmem:[#allocation13] sm:$0x1] %vm1064_vm4, %v1057_v16  ;;  %v1041_v44 = vpop.xlane.xlu1 %1040 }
 0x2eb   :  { %v540_v19 = vmul.f32 0.5, %v536_v20  ;;  %v533_v42 = vmul.f32 0.6931472, %v1210_v39  ;;  %v1051_v11 = vsel %vm1049_vm8, %v1041_v44, -1e+30 }
 0x2ec   :  { %v545_v60 = vadd.f32 %v541_v35, %v521_v6  ;;  %v539_v62 = vsub.f32 0.0, %v535_v25  ;;  %v1061_v61 = vrot.slane %v1051_v11, %v1883_v46 }
 0x2ed   :  { %v544_v49 = vadd.f32 %v540_v19, %v520_v47  ;;  %v538_v21 = vsub.f32 0.0, %v533_v42 }
 0x2ee   :  { %v657_v2 = vsel %vm501_vm15, %v545_v60, 0.0  ;;  %v543_v15 = vmul.f32 0.5, %v539_v62  ;;  %1066 = vst.msk [vmem:[#allocation13 + $0x1] sm:$0x1] %vm1064_vm4, %v1061_v61 }
 0x2ef   :  { %v741_v0 = vrot.slane %v657_v2, %v1886_v45  ;;  %v656_v8 = vsel %vm500_vm1, %v544_v49, 0.0  ;;  %v542_v56 = vmul.f32 0.5, %v538_v21 }
 0x2f0   :  { %1354 = shalt.err (!%p1351_p10)
}
 0x2f1   :  { %s1355_s29 = scalar_lea.hbm %s2119_s9, 32 }
 0x2f2   :  { %p1356_p11 = scmp.ne.s32.totalorder %s2119_s9, %s1355_s29  ;;  %p1359_p12 = scmp.lt.u32.totalorder %s1355_s29, %s2119_s9 }
 0x2f4   :  { %p1361_p13 = pnand %p1359_p12, %p1356_p11 }
 0x2f6   :  { %1364 = shalt.err (!%p1361_p13)
}
 0x2f7   :  { %s1389_s22 = smov 16   ;;  %s1390_s19 = smov 1   ;;  %v737_v1 = vrot.slane %v656_v8, %v1883_v46  ;;  %v547_v24 = vadd.f32 %v543_v15, %v523_v13  ;;  %vm674_vm9 = vcmp.eq.s32.totalorder %v1662_v30, 0  ;;  %v546_v5 = vadd.f32 %v542_v56, %v2030_v41 }
 0x2f8   :  { %1080 = dma.vmem_to_hbm [thread:$0]  %s2053_s27, 32, %s2119_s9, [#allocation4], %s1389_s22, %s1389_s22, %s1390_s19   ;;  %vm758_vm10 = vcmask 124928   ;;  %v697_v63 = vsel %vm390_vm3, %v696_v27, %v692_v4  ;;  %v728_v52 = vsel %vm675_vm7, %v688_v43, %v714_v29  ;;  %v723_v28 = vsel %vm390_vm3, %v722_v55, %v718_v50 }
 0x2f9   :  { %v742_v3 = vsel %vm390_vm3, %v741_v0, %v737_v1  ;;  %v659_v40 = vsel %vm503_vm5, %v547_v24, 0.0  ;;  %v658_v48 = vsel %vm502_vm6, %v546_v5, 0.0  ;;  %v729_v58 = vsel %vm675_vm7, %v697_v63, %v723_v28 }
 0x2fa   :  { %v750_v10 = vrot.slane %v659_v40, %v1886_v45  ;;  %v756_v57 = vsel %vm674_vm9, %v742_v3, %v728_v52  ;;  %v746_v37 = vrot.slane %v658_v48, %v1883_v46 }
 0x2fb   :  { %759 = vst.msk [vmem:[%s2118_s8] sm:$0x7] %vm758_vm10, %v756_v57 }
 0x2fc   :  { %v751_v26 = vsel %vm390_vm3, %v750_v10, %v746_v37 }
 0x2fd   :  { %v757_v6 = vsel %vm674_vm9, %v751_v26, %v729_v58 }
 0x2fe   :  { %760 = vst.msk [vmem:[%s2118_s8 + $0x4] sm:$0x7] %vm758_vm10, %v757_v6 }
 0x2ff   :  { %1373 = dma.done.wait [#allocation4], 32  }
 0x300   :  { %1374 = vsyncadd [#allocation4], 4294967264 }
 0x301   :  { %1086 = vsyncpa [#allocation3], 1 }
 0x302   :  { %1087 = vsyncpa [#allocation6], 1 }
 0x303   :  { %1088 = vsyncpa [#allocation9], 1 }
 0x304   :  { %1089 = vsyncpa [#allocation12], 1 }
 0x305   :  { %1090 = vsyncpa [#allocation4], 1 }

</bundles_post_ra>
